<compile_context>
chip_gen: v7x
topology: tpu7x:2x2x1
jax: 0.10.0
libtpu: 0.0.40
codegen_flags: <defaults>
</compile_context>

<pallas_src>
from functools import partial

import jax
import jax.numpy as jnp
from jax.experimental import pallas as pl
from jax.experimental.pallas import tpu as pltpu

COMPUTE_DTYPE = jnp.bfloat16          # MXU operand dtype (accumulation stays f32)
VMEM_LIMIT_BYTES = 32 * 1024 * 1024   # scoped VMEM budget, <= physical on v5e/v6e/v7x


# ------------------------------------------------------------------- kernels --

def qkv_heads_kernel(x_ref, wq_ref, wk_ref, wv_ref, q_ref, k_ref, v_ref, *, hblk):
    """Fused QKV projection + head split for one (batch, head-group) tile.

    x_ref : (1, N, C)           activations
    w*_ref: (1, hblk, C, hd)    pre-transposed per-head weights (bf16)
    *_ref : (1, hblk, N, hd)    q / k / v outputs (bf16), already head-major
    """
    x = x_ref[0].astype(COMPUTE_DTYPE)                       # (N, C), loaded once per step
    for h in range(hblk):                                    # static unroll, hblk is small
        q_ref[0, h] = jnp.dot(x, wq_ref[0, h],
                              preferred_element_type=jnp.float32).astype(q_ref.dtype)
        k_ref[0, h] = jnp.dot(x, wk_ref[0, h],
                              preferred_element_type=jnp.float32).astype(k_ref.dtype)
        v_ref[0, h] = jnp.dot(x, wv_ref[0, h],
                              preferred_element_type=jnp.float32).astype(v_ref.dtype)


def flash_attn_kernel(q_ref, k_ref, v_ref, o_ref, m_sc, l_sc, acc_sc, *, scale):
    """Online-softmax attention. Grid = (B, G, Nq_tiles, Nkv_tiles); KV axis last."""
    j = pl.program_id(3)

    @pl.when(j == 0)
    def _():
        m_sc[...] = jnp.full(m_sc.shape, -jnp.inf, m_sc.dtype)
        l_sc[...] = jnp.zeros(l_sc.shape, l_sc.dtype)
        acc_sc[...] = jnp.zeros(acc_sc.shape, acc_sc.dtype)

    q = q_ref[0]                                             # (hblk, tq,  hd) bf16
    k = k_ref[0]                                             # (hblk, tkv, hd) bf16
    v = v_ref[0]                                             # (hblk, tkv, hd) bf16

    # bf16 MXU matmul, f32 scores; scale folded into f32 scores (== (q*scale) @ k^T)
    s = jnp.einsum("hqd,hkd->hqk", q, k,
                   preferred_element_type=jnp.float32) * scale      # (hblk, tq, tkv)

    m_prev = m_sc[...]
    m_new = jnp.maximum(m_prev, jnp.max(s, axis=-1, keepdims=True))
    alpha = jnp.exp(m_prev - m_new)                          # f32 (hblk, tq, 1)
    p = jnp.exp(s - m_new)                                   # f32 softmax numerator
    l_sc[...] = alpha * l_sc[...] + jnp.sum(p, axis=-1, keepdims=True)
    acc_sc[...] = alpha * acc_sc[...] + jnp.einsum(
        "hqk,hkd->hqd", p.astype(v.dtype), v, preferred_element_type=jnp.float32)
    m_sc[...] = m_new

    @pl.when(j == pl.num_programs(3) - 1)
    def _():
        inv_l = pl.reciprocal(l_sc[...], approx=True)        # EUP slot, not a VALU divide
        o_ref[0] = (acc_sc[...] * inv_l).astype(o_ref.dtype)


def proj_merge_kernel(o_ref, w_ref, b_ref, y_ref, acc_ref, *, hblk):
    """Output projection + bias; the head axis is the grid contraction axis, so the
    head-merge transpose is absorbed into the GEMM's reduction structure.

    o_ref: (1, hblk, tn, hd)  attention output tile (bf16)
    w_ref: (1, hblk, hd, C)   pre-transposed proj weight tile (bf16)
    b_ref: (1, C)             bias (f32)
    y_ref: (1, tn, C)         lane-dense output tile, written on the last step
    """
    g = pl.program_id(2)

    @pl.when(g == 0)
    def _():
        acc_ref[...] = jnp.zeros(acc_ref.shape, acc_ref.dtype)

    acc = acc_ref[...]
    for h in range(hblk):                                    # static unroll
        acc = acc + jnp.dot(o_ref[0, h], w_ref[0, h],
                            preferred_element_type=jnp.float32)
    acc_ref[...] = acc

    @pl.when(g == pl.num_programs(2) - 1)
    def _():
        y_ref[0] = (acc_ref[...] + b_ref[...]).astype(y_ref.dtype)


# ------------------------------------------------------------------- wrapper --

def _head_group_size(num_heads, head_dim):
    # pack heads so one grid step covers roughly >= 128 lanes worth of head_dim
    hblk = max(1, min(num_heads, max(1, 128 // head_dim)))
    while num_heads % hblk:
        hblk -= 1
    return hblk


def attention_forward(x, wqkv, wproj, bproj, num_heads):
    """Pallas forward of Attention (eval: qkv_bias=False, qk_norm=False, dropout=0)."""
    B, N, C = x.shape
    H = num_heads
    hd = C // H
    scale = float(hd) ** -0.5

    hblk = _head_group_size(H, hd)
    G = H // hblk

    tq = N if N <= 128 else 128
    tkv = N if N <= 128 else 128
    tn = tq
    assert N % tq == 0 and N % tkv == 0, "sequence length must tile evenly"

    # ---- one-time weight layout plumbing (wrapper side, no in-kernel .T) -----
    # qkv weight (3C, C) -> (3, H, C, hd): q_h = x @ w3[0, h], etc.
    w3 = jnp.transpose(wqkv.reshape(3, H, hd, C), (0, 1, 3, 2)).astype(COMPUTE_DTYPE)
    wq = w3[0].reshape(G, hblk, C, hd)
    wk = w3[1].reshape(G, hblk, C, hd)
    wv = w3[2].reshape(G, hblk, C, hd)
    # proj weight (C, C) -> (G, hblk, hd, C): y = sum_h o_h @ wp[g, h]
    wp = wproj.T.reshape(G, hblk, hd, C).astype(COMPUTE_DTYPE)
    bp = bproj.reshape(1, C).astype(jnp.float32)

    itemsize = x.dtype.itemsize
    cdt = jnp.dtype(COMPUTE_DTYPE).itemsize

    # ---- 1) fused QKV projection + head split: (B,N,C) -> 3 x (B,H,N,hd) -----
    qkv_cost = pl.CostEstimate(
        flops=6 * B * N * C * C, transcendentals=0,
        bytes_accessed=G * B * N * C * itemsize + 3 * C * C * cdt + 3 * B * N * C * cdt)
    head_spec = pl.BlockSpec((1, hblk, N, hd), lambda b, g: (b, g, 0, 0))
    w_spec = pl.BlockSpec((1, hblk, C, hd), lambda b, g: (g, 0, 0, 0))
    q, k, v = pl.pallas_call(
        partial(qkv_heads_kernel, hblk=hblk),
        out_shape=tuple(jax.ShapeDtypeStruct((B, H, N, hd), COMPUTE_DTYPE)
                        for _ in range(3)),
        grid=(B, G),
        in_specs=[pl.BlockSpec((1, N, C), lambda b, g: (b, 0, 0)),
                  w_spec, w_spec, w_spec],
        out_specs=(head_spec, head_spec, head_spec),
        compiler_params=pltpu.CompilerParams(
            dimension_semantics=("parallel", "parallel"),
            vmem_limit_bytes=VMEM_LIMIT_BYTES),
        cost_estimate=qkv_cost,
    )(x, wq, wk, wv)

    # ---- 2) flash attention over KV tiles: (B,H,N,hd) -> (B,H,N,hd) ----------
    attn_cost = pl.CostEstimate(
        flops=4 * B * H * N * N * hd, transcendentals=B * H * N * N,
        bytes_accessed=(2 + 2 * (N // tq)) * B * H * N * hd * cdt)
    o = pl.pallas_call(
        partial(flash_attn_kernel, scale=scale),
        out_shape=jax.ShapeDtypeStruct((B, H, N, hd), COMPUTE_DTYPE),
        grid=(B, G, N // tq, N // tkv),
        in_specs=[
            pl.BlockSpec((1, hblk, tq, hd), lambda b, g, i, j: (b, g, i, 0)),
            pl.BlockSpec((1, hblk, tkv, hd), lambda b, g, i, j: (b, g, j, 0)),
            pl.BlockSpec((1, hblk, tkv, hd), lambda b, g, i, j: (b, g, j, 0)),
        ],
        out_specs=pl.BlockSpec((1, hblk, tq, hd), lambda b, g, i, j: (b, g, i, 0)),
        scratch_shapes=[pltpu.VMEM((hblk, tq, 1), jnp.float32),
                        pltpu.VMEM((hblk, tq, 1), jnp.float32),
                        pltpu.VMEM((hblk, tq, hd), jnp.float32)],
        compiler_params=pltpu.CompilerParams(
            dimension_semantics=("parallel", "parallel", "parallel", "arbitrary"),
            vmem_limit_bytes=VMEM_LIMIT_BYTES),
        cost_estimate=attn_cost,
    )(q, k, v)

    # ---- 3) head-merge + output projection + bias -> (B, N, C) ---------------
    proj_cost = pl.CostEstimate(
        flops=2 * B * N * C * C, transcendentals=0,
        bytes_accessed=B * N * C * cdt + C * C * cdt + B * N * C * itemsize + C * 4)
    y = pl.pallas_call(
        partial(proj_merge_kernel, hblk=hblk),
        out_shape=jax.ShapeDtypeStruct((B, N, C), x.dtype),
        grid=(B, N // tn, G),
        in_specs=[
            pl.BlockSpec((1, hblk, tn, hd), lambda b, i, g: (b, g, i, 0)),
            pl.BlockSpec((1, hblk, hd, C), lambda b, i, g: (g, 0, 0, 0)),
            pl.BlockSpec((1, C), lambda b, i, g: (0, 0)),
        ],
        out_specs=pl.BlockSpec((1, tn, C), lambda b, i, g: (b, i, 0)),
        scratch_shapes=[pltpu.VMEM((tn, C), jnp.float32)],
        compiler_params=pltpu.CompilerParams(
            dimension_semantics=("parallel", "parallel", "arbitrary"),
            vmem_limit_bytes=VMEM_LIMIT_BYTES),
        cost_estimate=proj_cost,
    )(o, wp, bp)
    return y


# ----------------------------------------------------------------- reference --

def attention_ref(x, wqkv, wproj, bproj, num_heads):
    B, N, C = x.shape
    hd = C // num_heads
    scale = hd ** (-0.5)
    qkv = x @ wqkv.T
    qkv = qkv.reshape(B, N, 3, num_heads, hd).transpose(2, 0, 3, 1, 4)
    q, k, v = qkv[0], qkv[1], qkv[2]
    attn = jax.nn.softmax((q * scale) @ jnp.swapaxes(k, -2, -1), axis=-1)
    o = attn @ v
    o = o.transpose(0, 2, 1, 3).reshape(B, N, C)
    return o @ wproj.T + bproj


# ---------------------------------------------------------------------- main --

if __name__ == "__main__":
    B, N, C = 2, 8, 32
    num_heads = 8                      # head_dim = 4

    key = jax.random.PRNGKey(0)
    kx, kqkv, kp, kb = jax.random.split(key, 4)

    x = jax.random.normal(kx, (B, N, C), dtype=jnp.float32)
    wqkv = jax.random.normal(kqkv, (3 * C, C), dtype=jnp.float32) * 0.05
    wproj = jax.random.normal(kp, (C, C), dtype=jnp.float32) * 0.05
    bproj = jax.random.normal(kb, (C,), dtype=jnp.float32) * 0.01

    fwd = jax.jit(partial(attention_forward, num_heads=num_heads))
    out = jax.block_until_ready(fwd(x, wqkv, wproj, bproj))

    ref = attention_ref(x, wqkv, wproj, bproj, num_heads)
    assert out.shape == (B, N, C)
    max_err = float(jnp.max(jnp.abs(out - ref)))
    # bf16 MXU operands + approx reciprocal + online softmax -> loosened tolerance
    assert jnp.allclose(out, ref, atol=2e-2, rtol=2e-2), f"mismatch vs reference ({max_err})"

    print("KERNEL_OK")
</pallas_src>

<mosaic_0001>
module attributes {stable_mosaic.version = 11 : i64} {
  func.func @qkv_heads_kernel(%arg0: i32, %arg1: i32, %arg2: memref<1x8x32xf32, #tpu.memory_space<vmem>>, %arg3: memref<1x8x32x4xbf16, #tpu.memory_space<vmem>>, %arg4: memref<1x8x32x4xbf16, #tpu.memory_space<vmem>>, %arg5: memref<1x8x32x4xbf16, #tpu.memory_space<vmem>>, %arg6: memref<1x8x8x4xbf16, #tpu.memory_space<vmem>>, %arg7: memref<1x8x8x4xbf16, #tpu.memory_space<vmem>>, %arg8: memref<1x8x8x4xbf16, #tpu.memory_space<vmem>>) attributes {dimension_semantics = [#tpu.dimension_semantics<parallel>, #tpu.dimension_semantics<parallel>], iteration_bounds = array<i64: 2, 1>, scalar_prefetch = 0 : i64, scratch_operands = 0 : i64, tpu.core_type = #tpu.core_type<tc>, window_params = [{transform_indices = @transform_0, window_bounds = array<i64: 1, 8, 32>}, {transform_indices = @transform_1, window_bounds = array<i64: 1, 8, 32, 4>}, {transform_indices = @transform_2, window_bounds = array<i64: 1, 8, 32, 4>}, {transform_indices = @transform_3, window_bounds = array<i64: 1, 8, 32, 4>}, {transform_indices = @transform_4, window_bounds = array<i64: 1, 8, 8, 4>}, {transform_indices = @transform_5, window_bounds = array<i64: 1, 8, 8, 4>}, {transform_indices = @transform_6, window_bounds = array<i64: 1, 8, 8, 4>}]} {
    %c0 = arith.constant 0 : index
    %c0_0 = arith.constant 0 : index
    %c0_1 = arith.constant 0 : index
    %0 = vector.load %arg2[%c0, %c0_0, %c0_1] : memref<1x8x32xf32, #tpu.memory_space<vmem>>, vector<1x8x32xf32>
    %1 = vector.shape_cast %0 : vector<1x8x32xf32> to vector<8x32xf32>
    %2 = arith.truncf %1 : vector<8x32xf32> to vector<8x32xbf16>
    %c0_2 = arith.constant 0 : index
    %c0_3 = arith.constant 0 : index
    %c0_4 = arith.constant 0 : index
    %c0_5 = arith.constant 0 : index
    %3 = vector.load %arg3[%c0_2, %c0_3, %c0_4, %c0_5] : memref<1x8x32x4xbf16, #tpu.memory_space<vmem>>, vector<1x1x32x4xbf16>
    %4 = vector.shape_cast %3 : vector<1x1x32x4xbf16> to vector<32x4xbf16>
    %cst = arith.constant dense<0.000000e+00> : vector<8x4xf32>
    %5 = tpu.matmul %2, %4, %cst {dimension_numbers = #tpu.dot_dimension_numbers<[1], [0], [0], [1], [0, 0, 1, 1], [], []>} : vector<8x32xbf16>, vector<32x4xbf16>, vector<8x4xf32> -> vector<8x4xf32>
    %6 = arith.truncf %5 : vector<8x4xf32> to vector<8x4xbf16>
    %c0_6 = arith.constant 0 : index
    %c0_7 = arith.constant 0 : index
    %c0_8 = arith.constant 0 : index
    %c0_9 = arith.constant 0 : index
    %7 = vector.load %arg6[%c0_6, %c0_7, %c0_8, %c0_9] : memref<1x8x8x4xbf16, #tpu.memory_space<vmem>>, vector<1x1x8x4xbf16>
    %8 = vector.shape_cast %7 : vector<1x1x8x4xbf16> to vector<8x4xbf16>
    %9 = vector.shape_cast %6 : vector<8x4xbf16> to vector<1x1x8x4xbf16>
    tpu.vector_store %arg6[%c0_6, %c0_7, %c0_8, %c0_9], %9 {strides = array<i32>} : memref<1x8x8x4xbf16, #tpu.memory_space<vmem>>, vector<1x1x8x4xbf16>,
    %c0_10 = arith.constant 0 : index
    %c0_11 = arith.constant 0 : index
    %c0_12 = arith.constant 0 : index
    %c0_13 = arith.constant 0 : index
    %10 = vector.load %arg4[%c0_10, %c0_11, %c0_12, %c0_13] : memref<1x8x32x4xbf16, #tpu.memory_space<vmem>>, vector<1x1x32x4xbf16>
    %11 = vector.shape_cast %10 : vector<1x1x32x4xbf16> to vector<32x4xbf16>
    %cst_14 = arith.constant dense<0.000000e+00> : vector<8x4xf32>
    %12 = tpu.matmul %2, %11, %cst_14 {dimension_numbers = #tpu.dot_dimension_numbers<[1], [0], [0], [1], [0, 0, 1, 1], [], []>} : vector<8x32xbf16>, vector<32x4xbf16>, vector<8x4xf32> -> vector<8x4xf32>
    %13 = arith.truncf %12 : vector<8x4xf32> to vector<8x4xbf16>
    %c0_15 = arith.constant 0 : index
    %c0_16 = arith.constant 0 : index
    %c0_17 = arith.constant 0 : index
    %c0_18 = arith.constant 0 : index
    %14 = vector.load %arg7[%c0_15, %c0_16, %c0_17, %c0_18] : memref<1x8x8x4xbf16, #tpu.memory_space<vmem>>, vector<1x1x8x4xbf16>
    %15 = vector.shape_cast %14 : vector<1x1x8x4xbf16> to vector<8x4xbf16>
    %16 = vector.shape_cast %13 : vector<8x4xbf16> to vector<1x1x8x4xbf16>
    tpu.vector_store %arg7[%c0_15, %c0_16, %c0_17, %c0_18], %16 {strides = array<i32>} : memref<1x8x8x4xbf16, #tpu.memory_space<vmem>>, vector<1x1x8x4xbf16>,
    %c0_19 = arith.constant 0 : index
    %c0_20 = arith.constant 0 : index
    %c0_21 = arith.constant 0 : index
    %c0_22 = arith.constant 0 : index
    %17 = vector.load %arg5[%c0_19, %c0_20, %c0_21, %c0_22] : memref<1x8x32x4xbf16, #tpu.memory_space<vmem>>, vector<1x1x32x4xbf16>
    %18 = vector.shape_cast %17 : vector<1x1x32x4xbf16> to vector<32x4xbf16>
    %cst_23 = arith.constant dense<0.000000e+00> : vector<8x4xf32>
    %19 = tpu.matmul %2, %18, %cst_23 {dimension_numbers = #tpu.dot_dimension_numbers<[1], [0], [0], [1], [0, 0, 1, 1], [], []>} : vector<8x32xbf16>, vector<32x4xbf16>, vector<8x4xf32> -> vector<8x4xf32>
    %20 = arith.truncf %19 : vector<8x4xf32> to vector<8x4xbf16>
    %c0_24 = arith.constant 0 : index
    %c0_25 = arith.constant 0 : index
    %c0_26 = arith.constant 0 : index
    %c0_27 = arith.constant 0 : index
    %21 = vector.load %arg8[%c0_24, %c0_25, %c0_26, %c0_27] : memref<1x8x8x4xbf16, #tpu.memory_space<vmem>>, vector<1x1x8x4xbf16>
    %22 = vector.shape_cast %21 : vector<1x1x8x4xbf16> to vector<8x4xbf16>
    %23 = vector.shape_cast %20 : vector<8x4xbf16> to vector<1x1x8x4xbf16>
    tpu.vector_store %arg8[%c0_24, %c0_25, %c0_26, %c0_27], %23 {strides = array<i32>} : memref<1x8x8x4xbf16, #tpu.memory_space<vmem>>, vector<1x1x8x4xbf16>,
    %c0_28 = arith.constant 0 : index
    %c1 = arith.constant 1 : index
    %c0_29 = arith.constant 0 : index
    %c0_30 = arith.constant 0 : index
    %24 = vector.load %arg3[%c0_28, %c1, %c0_29, %c0_30] : memref<1x8x32x4xbf16, #tpu.memory_space<vmem>>, vector<1x1x32x4xbf16>
    %25 = vector.shape_cast %24 : vector<1x1x32x4xbf16> to vector<32x4xbf16>
    %cst_31 = arith.constant dense<0.000000e+00> : vector<8x4xf32>
    %26 = tpu.matmul %2, %25, %cst_31 {dimension_numbers = #tpu.dot_dimension_numbers<[1], [0], [0], [1], [0, 0, 1, 1], [], []>} : vector<8x32xbf16>, vector<32x4xbf16>, vector<8x4xf32> -> vector<8x4xf32>
    %27 = arith.truncf %26 : vector<8x4xf32> to vector<8x4xbf16>
    %c0_32 = arith.constant 0 : index
    %c1_33 = arith.constant 1 : index
    %c0_34 = arith.constant 0 : index
    %c0_35 = arith.constant 0 : index
    %28 = vector.load %arg6[%c0_32, %c1_33, %c0_34, %c0_35] : memref<1x8x8x4xbf16, #tpu.memory_space<vmem>>, vector<1x1x8x4xbf16>
    %29 = vector.shape_cast %28 : vector<1x1x8x4xbf16> to vector<8x4xbf16>
    %30 = vector.shape_cast %27 : vector<8x4xbf16> to vector<1x1x8x4xbf16>
    tpu.vector_store %arg6[%c0_32, %c1_33, %c0_34, %c0_35], %30 {strides = array<i32>} : memref<1x8x8x4xbf16, #tpu.memory_space<vmem>>, vector<1x1x8x4xbf16>,
    %c0_36 = arith.constant 0 : index
    %c1_37 = arith.constant 1 : index
    %c0_38 = arith.constant 0 : index
    %c0_39 = arith.constant 0 : index
    %31 = vector.load %arg4[%c0_36, %c1_37, %c0_38, %c0_39] : memref<1x8x32x4xbf16, #tpu.memory_space<vmem>>, vector<1x1x32x4xbf16>
    %32 = vector.shape_cast %31 : vector<1x1x32x4xbf16> to vector<32x4xbf16>
    %cst_40 = arith.constant dense<0.000000e+00> : vector<8x4xf32>
    %33 = tpu.matmul %2, %32, %cst_40 {dimension_numbers = #tpu.dot_dimension_numbers<[1], [0], [0], [1], [0, 0, 1, 1], [], []>} : vector<8x32xbf16>, vector<32x4xbf16>, vector<8x4xf32> -> vector<8x4xf32>
    %34 = arith.truncf %33 : vector<8x4xf32> to vector<8x4xbf16>
    %c0_41 = arith.constant 0 : index
    %c1_42 = arith.constant 1 : index
    %c0_43 = arith.constant 0 : index
    %c0_44 = arith.constant 0 : index
    %35 = vector.load %arg7[%c0_41, %c1_42, %c0_43, %c0_44] : memref<1x8x8x4xbf16, #tpu.memory_space<vmem>>, vector<1x1x8x4xbf16>
    %36 = vector.shape_cast %35 : vector<1x1x8x4xbf16> to vector<8x4xbf16>
    %37 = vector.shape_cast %34 : vector<8x4xbf16> to vector<1x1x8x4xbf16>
    tpu.vector_store %arg7[%c0_41, %c1_42, %c0_43, %c0_44], %37 {strides = array<i32>} : memref<1x8x8x4xbf16, #tpu.memory_space<vmem>>, vector<1x1x8x4xbf16>,
    %c0_45 = arith.constant 0 : index
    %c1_46 = arith.constant 1 : index
    %c0_47 = arith.constant 0 : index
    %c0_48 = arith.constant 0 : index
    %38 = vector.load %arg5[%c0_45, %c1_46, %c0_47, %c0_48] : memref<1x8x32x4xbf16, #tpu.memory_space<vmem>>, vector<1x1x32x4xbf16>
    %39 = vector.shape_cast %38 : vector<1x1x32x4xbf16> to vector<32x4xbf16>
    %cst_49 = arith.constant dense<0.000000e+00> : vector<8x4xf32>
    %40 = tpu.matmul %2, %39, %cst_49 {dimension_numbers = #tpu.dot_dimension_numbers<[1], [0], [0], [1], [0, 0, 1, 1], [], []>} : vector<8x32xbf16>, vector<32x4xbf16>, vector<8x4xf32> -> vector<8x4xf32>
    %41 = arith.truncf %40 : vector<8x4xf32> to vector<8x4xbf16>
    %c0_50 = arith.constant 0 : index
    %c1_51 = arith.constant 1 : index
    %c0_52 = arith.constant 0 : index
    %c0_53 = arith.constant 0 : index
    %42 = vector.load %arg8[%c0_50, %c1_51, %c0_52, %c0_53] : memref<1x8x8x4xbf16, #tpu.memory_space<vmem>>, vector<1x1x8x4xbf16>
    %43 = vector.shape_cast %42 : vector<1x1x8x4xbf16> to vector<8x4xbf16>
    %44 = vector.shape_cast %41 : vector<8x4xbf16> to vector<1x1x8x4xbf16>
    tpu.vector_store %arg8[%c0_50, %c1_51, %c0_52, %c0_53], %44 {strides = array<i32>} : memref<1x8x8x4xbf16, #tpu.memory_space<vmem>>, vector<1x1x8x4xbf16>,
    %c0_54 = arith.constant 0 : index
    %c2 = arith.constant 2 : index
    %c0_55 = arith.constant 0 : index
    %c0_56 = arith.constant 0 : index
    %45 = vector.load %arg3[%c0_54, %c2, %c0_55, %c0_56] : memref<1x8x32x4xbf16, #tpu.memory_space<vmem>>, vector<1x1x32x4xbf16>
    %46 = vector.shape_cast %45 : vector<1x1x32x4xbf16> to vector<32x4xbf16>
    %cst_57 = arith.constant dense<0.000000e+00> : vector<8x4xf32>
    %47 = tpu.matmul %2, %46, %cst_57 {dimension_numbers = #tpu.dot_dimension_numbers<[1], [0], [0], [1], [0, 0, 1, 1], [], []>} : vector<8x32xbf16>, vector<32x4xbf16>, vector<8x4xf32> -> vector<8x4xf32>
    %48 = arith.truncf %47 : vector<8x4xf32> to vector<8x4xbf16>
    %c0_58 = arith.constant 0 : index
    %c2_59 = arith.constant 2 : index
    %c0_60 = arith.constant 0 : index
    %c0_61 = arith.constant 0 : index
    %49 = vector.load %arg6[%c0_58, %c2_59, %c0_60, %c0_61] : memref<1x8x8x4xbf16, #tpu.memory_space<vmem>>, vector<1x1x8x4xbf16>
    %50 = vector.shape_cast %49 : vector<1x1x8x4xbf16> to vector<8x4xbf16>
    %51 = vector.shape_cast %48 : vector<8x4xbf16> to vector<1x1x8x4xbf16>
    tpu.vector_store %arg6[%c0_58, %c2_59, %c0_60, %c0_61], %51 {strides = array<i32>} : memref<1x8x8x4xbf16, #tpu.memory_space<vmem>>, vector<1x1x8x4xbf16>,
    %c0_62 = arith.constant 0 : index
    %c2_63 = arith.constant 2 : index
    %c0_64 = arith.constant 0 : index
    %c0_65 = arith.constant 0 : index
    %52 = vector.load %arg4[%c0_62, %c2_63, %c0_64, %c0_65] : memref<1x8x32x4xbf16, #tpu.memory_space<vmem>>, vector<1x1x32x4xbf16>
    %53 = vector.shape_cast %52 : vector<1x1x32x4xbf16> to vector<32x4xbf16>
    %cst_66 = arith.constant dense<0.000000e+00> : vector<8x4xf32>
    %54 = tpu.matmul %2, %53, %cst_66 {dimension_numbers = #tpu.dot_dimension_numbers<[1], [0], [0], [1], [0, 0, 1, 1], [], []>} : vector<8x32xbf16>, vector<32x4xbf16>, vector<8x4xf32> -> vector<8x4xf32>
    %55 = arith.truncf %54 : vector<8x4xf32> to vector<8x4xbf16>
    %c0_67 = arith.constant 0 : index
    %c2_68 = arith.constant 2 : index
    %c0_69 = arith.constant 0 : index
    %c0_70 = arith.constant 0 : index
    %56 = vector.load %arg7[%c0_67, %c2_68, %c0_69, %c0_70] : memref<1x8x8x4xbf16, #tpu.memory_space<vmem>>, vector<1x1x8x4xbf16>
    %57 = vector.shape_cast %56 : vector<1x1x8x4xbf16> to vector<8x4xbf16>
    %58 = vector.shape_cast %55 : vector<8x4xbf16> to vector<1x1x8x4xbf16>
    tpu.vector_store %arg7[%c0_67, %c2_68, %c0_69, %c0_70], %58 {strides = array<i32>} : memref<1x8x8x4xbf16, #tpu.memory_space<vmem>>, vector<1x1x8x4xbf16>,
    %c0_71 = arith.constant 0 : index
    %c2_72 = arith.constant 2 : index
    %c0_73 = arith.constant 0 : index
    %c0_74 = arith.constant 0 : index
    %59 = vector.load %arg5[%c0_71, %c2_72, %c0_73, %c0_74] : memref<1x8x32x4xbf16, #tpu.memory_space<vmem>>, vector<1x1x32x4xbf16>
    %60 = vector.shape_cast %59 : vector<1x1x32x4xbf16> to vector<32x4xbf16>
    %cst_75 = arith.constant dense<0.000000e+00> : vector<8x4xf32>
    %61 = tpu.matmul %2, %60, %cst_75 {dimension_numbers = #tpu.dot_dimension_numbers<[1], [0], [0], [1], [0, 0, 1, 1], [], []>} : vector<8x32xbf16>, vector<32x4xbf16>, vector<8x4xf32> -> vector<8x4xf32>
    %62 = arith.truncf %61 : vector<8x4xf32> to vector<8x4xbf16>
    %c0_76 = arith.constant 0 : index
    %c2_77 = arith.constant 2 : index
    %c0_78 = arith.constant 0 : index
    %c0_79 = arith.constant 0 : index
    %63 = vector.load %arg8[%c0_76, %c2_77, %c0_78, %c0_79] : memref<1x8x8x4xbf16, #tpu.memory_space<vmem>>, vector<1x1x8x4xbf16>
    %64 = vector.shape_cast %63 : vector<1x1x8x4xbf16> to vector<8x4xbf16>
    %65 = vector.shape_cast %62 : vector<8x4xbf16> to vector<1x1x8x4xbf16>
    tpu.vector_store %arg8[%c0_76, %c2_77, %c0_78, %c0_79], %65 {strides = array<i32>} : memref<1x8x8x4xbf16, #tpu.memory_space<vmem>>, vector<1x1x8x4xbf16>,
    %c0_80 = arith.constant 0 : index
    %c3 = arith.constant 3 : index
    %c0_81 = arith.constant 0 : index
    %c0_82 = arith.constant 0 : index
    %66 = vector.load %arg3[%c0_80, %c3, %c0_81, %c0_82] : memref<1x8x32x4xbf16, #tpu.memory_space<vmem>>, vector<1x1x32x4xbf16>
    %67 = vector.shape_cast %66 : vector<1x1x32x4xbf16> to vector<32x4xbf16>
    %cst_83 = arith.constant dense<0.000000e+00> : vector<8x4xf32>
    %68 = tpu.matmul %2, %67, %cst_83 {dimension_numbers = #tpu.dot_dimension_numbers<[1], [0], [0], [1], [0, 0, 1, 1], [], []>} : vector<8x32xbf16>, vector<32x4xbf16>, vector<8x4xf32> -> vector<8x4xf32>
    %69 = arith.truncf %68 : vector<8x4xf32> to vector<8x4xbf16>
    %c0_84 = arith.constant 0 : index
    %c3_85 = arith.constant 3 : index
    %c0_86 = arith.constant 0 : index
    %c0_87 = arith.constant 0 : index
    %70 = vector.load %arg6[%c0_84, %c3_85, %c0_86, %c0_87] : memref<1x8x8x4xbf16, #tpu.memory_space<vmem>>, vector<1x1x8x4xbf16>
    %71 = vector.shape_cast %70 : vector<1x1x8x4xbf16> to vector<8x4xbf16>
    %72 = vector.shape_cast %69 : vector<8x4xbf16> to vector<1x1x8x4xbf16>
    tpu.vector_store %arg6[%c0_84, %c3_85, %c0_86, %c0_87], %72 {strides = array<i32>} : memref<1x8x8x4xbf16, #tpu.memory_space<vmem>>, vector<1x1x8x4xbf16>,
    %c0_88 = arith.constant 0 : index
    %c3_89 = arith.constant 3 : index
    %c0_90 = arith.constant 0 : index
    %c0_91 = arith.constant 0 : index
    %73 = vector.load %arg4[%c0_88, %c3_89, %c0_90, %c0_91] : memref<1x8x32x4xbf16, #tpu.memory_space<vmem>>, vector<1x1x32x4xbf16>
    %74 = vector.shape_cast %73 : vector<1x1x32x4xbf16> to vector<32x4xbf16>
    %cst_92 = arith.constant dense<0.000000e+00> : vector<8x4xf32>
    %75 = tpu.matmul %2, %74, %cst_92 {dimension_numbers = #tpu.dot_dimension_numbers<[1], [0], [0], [1], [0, 0, 1, 1], [], []>} : vector<8x32xbf16>, vector<32x4xbf16>, vector<8x4xf32> -> vector<8x4xf32>
    %76 = arith.truncf %75 : vector<8x4xf32> to vector<8x4xbf16>
    %c0_93 = arith.constant 0 : index
    %c3_94 = arith.constant 3 : index
    %c0_95 = arith.constant 0 : index
    %c0_96 = arith.constant 0 : index
    %77 = vector.load %arg7[%c0_93, %c3_94, %c0_95, %c0_96] : memref<1x8x8x4xbf16, #tpu.memory_space<vmem>>, vector<1x1x8x4xbf16>
    %78 = vector.shape_cast %77 : vector<1x1x8x4xbf16> to vector<8x4xbf16>
    %79 = vector.shape_cast %76 : vector<8x4xbf16> to vector<1x1x8x4xbf16>
    tpu.vector_store %arg7[%c0_93, %c3_94, %c0_95, %c0_96], %79 {strides = array<i32>} : memref<1x8x8x4xbf16, #tpu.memory_space<vmem>>, vector<1x1x8x4xbf16>,
    %c0_97 = arith.constant 0 : index
    %c3_98 = arith.constant 3 : index
    %c0_99 = arith.constant 0 : index
    %c0_100 = arith.constant 0 : index
    %80 = vector.load %arg5[%c0_97, %c3_98, %c0_99, %c0_100] : memref<1x8x32x4xbf16, #tpu.memory_space<vmem>>, vector<1x1x32x4xbf16>
    %81 = vector.shape_cast %80 : vector<1x1x32x4xbf16> to vector<32x4xbf16>
    %cst_101 = arith.constant dense<0.000000e+00> : vector<8x4xf32>
    %82 = tpu.matmul %2, %81, %cst_101 {dimension_numbers = #tpu.dot_dimension_numbers<[1], [0], [0], [1], [0, 0, 1, 1], [], []>} : vector<8x32xbf16>, vector<32x4xbf16>, vector<8x4xf32> -> vector<8x4xf32>
    %83 = arith.truncf %82 : vector<8x4xf32> to vector<8x4xbf16>
    %c0_102 = arith.constant 0 : index
    %c3_103 = arith.constant 3 : index
    %c0_104 = arith.constant 0 : index
    %c0_105 = arith.constant 0 : index
    %84 = vector.load %arg8[%c0_102, %c3_103, %c0_104, %c0_105] : memref<1x8x8x4xbf16, #tpu.memory_space<vmem>>, vector<1x1x8x4xbf16>
    %85 = vector.shape_cast %84 : vector<1x1x8x4xbf16> to vector<8x4xbf16>
    %86 = vector.shape_cast %83 : vector<8x4xbf16> to vector<1x1x8x4xbf16>
    tpu.vector_store %arg8[%c0_102, %c3_103, %c0_104, %c0_105], %86 {strides = array<i32>} : memref<1x8x8x4xbf16, #tpu.memory_space<vmem>>, vector<1x1x8x4xbf16>,
    %c0_106 = arith.constant 0 : index
    %c4 = arith.constant 4 : index
    %c0_107 = arith.constant 0 : index
    %c0_108 = arith.constant 0 : index
    %87 = vector.load %arg3[%c0_106, %c4, %c0_107, %c0_108] : memref<1x8x32x4xbf16, #tpu.memory_space<vmem>>, vector<1x1x32x4xbf16>
    %88 = vector.shape_cast %87 : vector<1x1x32x4xbf16> to vector<32x4xbf16>
    %cst_109 = arith.constant dense<0.000000e+00> : vector<8x4xf32>
    %89 = tpu.matmul %2, %88, %cst_109 {dimension_numbers = #tpu.dot_dimension_numbers<[1], [0], [0], [1], [0, 0, 1, 1], [], []>} : vector<8x32xbf16>, vector<32x4xbf16>, vector<8x4xf32> -> vector<8x4xf32>
    %90 = arith.truncf %89 : vector<8x4xf32> to vector<8x4xbf16>
    %c0_110 = arith.constant 0 : index
    %c4_111 = arith.constant 4 : index
    %c0_112 = arith.constant 0 : index
    %c0_113 = arith.constant 0 : index
    %91 = vector.load %arg6[%c0_110, %c4_111, %c0_112, %c0_113] : memref<1x8x8x4xbf16, #tpu.memory_space<vmem>>, vector<1x1x8x4xbf16>
    %92 = vector.shape_cast %91 : vector<1x1x8x4xbf16> to vector<8x4xbf16>
    %93 = vector.shape_cast %90 : vector<8x4xbf16> to vector<1x1x8x4xbf16>
    tpu.vector_store %arg6[%c0_110, %c4_111, %c0_112, %c0_113], %93 {strides = array<i32>} : memref<1x8x8x4xbf16, #tpu.memory_space<vmem>>, vector<1x1x8x4xbf16>,
    %c0_114 = arith.constant 0 : index
    %c4_115 = arith.constant 4 : index
    %c0_116 = arith.constant 0 : index
    %c0_117 = arith.constant 0 : index
    %94 = vector.load %arg4[%c0_114, %c4_115, %c0_116, %c0_117] : memref<1x8x32x4xbf16, #tpu.memory_space<vmem>>, vector<1x1x32x4xbf16>
    %95 = vector.shape_cast %94 : vector<1x1x32x4xbf16> to vector<32x4xbf16>
    %cst_118 = arith.constant dense<0.000000e+00> : vector<8x4xf32>
    %96 = tpu.matmul %2, %95, %cst_118 {dimension_numbers = #tpu.dot_dimension_numbers<[1], [0], [0], [1], [0, 0, 1, 1], [], []>} : vector<8x32xbf16>, vector<32x4xbf16>, vector<8x4xf32> -> vector<8x4xf32>
    %97 = arith.truncf %96 : vector<8x4xf32> to vector<8x4xbf16>
    %c0_119 = arith.constant 0 : index
    %c4_120 = arith.constant 4 : index
    %c0_121 = arith.constant 0 : index
    %c0_122 = arith.constant 0 : index
    %98 = vector.load %arg7[%c0_119, %c4_120, %c0_121, %c0_122] : memref<1x8x8x4xbf16, #tpu.memory_space<vmem>>, vector<1x1x8x4xbf16>
    %99 = vector.shape_cast %98 : vector<1x1x8x4xbf16> to vector<8x4xbf16>
    %100 = vector.shape_cast %97 : vector<8x4xbf16> to vector<1x1x8x4xbf16>
    tpu.vector_store %arg7[%c0_119, %c4_120, %c0_121, %c0_122], %100 {strides = array<i32>} : memref<1x8x8x4xbf16, #tpu.memory_space<vmem>>, vector<1x1x8x4xbf16>,
    %c0_123 = arith.constant 0 : index
    %c4_124 = arith.constant 4 : index
    %c0_125 = arith.constant 0 : index
    %c0_126 = arith.constant 0 : index
    %101 = vector.load %arg5[%c0_123, %c4_124, %c0_125, %c0_126] : memref<1x8x32x4xbf16, #tpu.memory_space<vmem>>, vector<1x1x32x4xbf16>
    %102 = vector.shape_cast %101 : vector<1x1x32x4xbf16> to vector<32x4xbf16>
    %cst_127 = arith.constant dense<0.000000e+00> : vector<8x4xf32>
    %103 = tpu.matmul %2, %102, %cst_127 {dimension_numbers = #tpu.dot_dimension_numbers<[1], [0], [0], [1], [0, 0, 1, 1], [], []>} : vector<8x32xbf16>, vector<32x4xbf16>, vector<8x4xf32> -> vector<8x4xf32>
    %104 = arith.truncf %103 : vector<8x4xf32> to vector<8x4xbf16>
    %c0_128 = arith.constant 0 : index
    %c4_129 = arith.constant 4 : index
    %c0_130 = arith.constant 0 : index
    %c0_131 = arith.constant 0 : index
    %105 = vector.load %arg8[%c0_128, %c4_129, %c0_130, %c0_131] : memref<1x8x8x4xbf16, #tpu.memory_space<vmem>>, vector<1x1x8x4xbf16>
    %106 = vector.shape_cast %105 : vector<1x1x8x4xbf16> to vector<8x4xbf16>
    %107 = vector.shape_cast %104 : vector<8x4xbf16> to vector<1x1x8x4xbf16>
    tpu.vector_store %arg8[%c0_128, %c4_129, %c0_130, %c0_131], %107 {strides = array<i32>} : memref<1x8x8x4xbf16, #tpu.memory_space<vmem>>, vector<1x1x8x4xbf16>,
    %c0_132 = arith.constant 0 : index
    %c5 = arith.constant 5 : index
    %c0_133 = arith.constant 0 : index
    %c0_134 = arith.constant 0 : index
    %108 = vector.load %arg3[%c0_132, %c5, %c0_133, %c0_134] : memref<1x8x32x4xbf16, #tpu.memory_space<vmem>>, vector<1x1x32x4xbf16>
    %109 = vector.shape_cast %108 : vector<1x1x32x4xbf16> to vector<32x4xbf16>
    %cst_135 = arith.constant dense<0.000000e+00> : vector<8x4xf32>
    %110 = tpu.matmul %2, %109, %cst_135 {dimension_numbers = #tpu.dot_dimension_numbers<[1], [0], [0], [1], [0, 0, 1, 1], [], []>} : vector<8x32xbf16>, vector<32x4xbf16>, vector<8x4xf32> -> vector<8x4xf32>
    %111 = arith.truncf %110 : vector<8x4xf32> to vector<8x4xbf16>
    %c0_136 = arith.constant 0 : index
    %c5_137 = arith.constant 5 : index
    %c0_138 = arith.constant 0 : index
    %c0_139 = arith.constant 0 : index
    %112 = vector.load %arg6[%c0_136, %c5_137, %c0_138, %c0_139] : memref<1x8x8x4xbf16, #tpu.memory_space<vmem>>, vector<1x1x8x4xbf16>
    %113 = vector.shape_cast %112 : vector<1x1x8x4xbf16> to vector<8x4xbf16>
    %114 = vector.shape_cast %111 : vector<8x4xbf16> to vector<1x1x8x4xbf16>
    tpu.vector_store %arg6[%c0_136, %c5_137, %c0_138, %c0_139], %114 {strides = array<i32>} : memref<1x8x8x4xbf16, #tpu.memory_space<vmem>>, vector<1x1x8x4xbf16>,
    %c0_140 = arith.constant 0 : index
    %c5_141 = arith.constant 5 : index
    %c0_142 = arith.constant 0 : index
    %c0_143 = arith.constant 0 : index
    %115 = vector.load %arg4[%c0_140, %c5_141, %c0_142, %c0_143] : memref<1x8x32x4xbf16, #tpu.memory_space<vmem>>, vector<1x1x32x4xbf16>
    %116 = vector.shape_cast %115 : vector<1x1x32x4xbf16> to vector<32x4xbf16>
    %cst_144 = arith.constant dense<0.000000e+00> : vector<8x4xf32>
    %117 = tpu.matmul %2, %116, %cst_144 {dimension_numbers = #tpu.dot_dimension_numbers<[1], [0], [0], [1], [0, 0, 1, 1], [], []>} : vector<8x32xbf16>, vector<32x4xbf16>, vector<8x4xf32> -> vector<8x4xf32>
    %118 = arith.truncf %117 : vector<8x4xf32> to vector<8x4xbf16>
    %c0_145 = arith.constant 0 : index
    %c5_146 = arith.constant 5 : index
    %c0_147 = arith.constant 0 : index
    %c0_148 = arith.constant 0 : index
    %119 = vector.load %arg7[%c0_145, %c5_146, %c0_147, %c0_148] : memref<1x8x8x4xbf16, #tpu.memory_space<vmem>>, vector<1x1x8x4xbf16>
    %120 = vector.shape_cast %119 : vector<1x1x8x4xbf16> to vector<8x4xbf16>
    %121 = vector.shape_cast %118 : vector<8x4xbf16> to vector<1x1x8x4xbf16>
    tpu.vector_store %arg7[%c0_145, %c5_146, %c0_147, %c0_148], %121 {strides = array<i32>} : memref<1x8x8x4xbf16, #tpu.memory_space<vmem>>, vector<1x1x8x4xbf16>,
    %c0_149 = arith.constant 0 : index
    %c5_150 = arith.constant 5 : index
    %c0_151 = arith.constant 0 : index
    %c0_152 = arith.constant 0 : index
    %122 = vector.load %arg5[%c0_149, %c5_150, %c0_151, %c0_152] : memref<1x8x32x4xbf16, #tpu.memory_space<vmem>>, vector<1x1x32x4xbf16>
    %123 = vector.shape_cast %122 : vector<1x1x32x4xbf16> to vector<32x4xbf16>
    %cst_153 = arith.constant dense<0.000000e+00> : vector<8x4xf32>
    %124 = tpu.matmul %2, %123, %cst_153 {dimension_numbers = #tpu.dot_dimension_numbers<[1], [0], [0], [1], [0, 0, 1, 1], [], []>} : vector<8x32xbf16>, vector<32x4xbf16>, vector<8x4xf32> -> vector<8x4xf32>
    %125 = arith.truncf %124 : vector<8x4xf32> to vector<8x4xbf16>
    %c0_154 = arith.constant 0 : index
    %c5_155 = arith.constant 5 : index
    %c0_156 = arith.constant 0 : index
    %c0_157 = arith.constant 0 : index
    %126 = vector.load %arg8[%c0_154, %c5_155, %c0_156, %c0_157] : memref<1x8x8x4xbf16, #tpu.memory_space<vmem>>, vector<1x1x8x4xbf16>
    %127 = vector.shape_cast %126 : vector<1x1x8x4xbf16> to vector<8x4xbf16>
    %128 = vector.shape_cast %125 : vector<8x4xbf16> to vector<1x1x8x4xbf16>
    tpu.vector_store %arg8[%c0_154, %c5_155, %c0_156, %c0_157], %128 {strides = array<i32>} : memref<1x8x8x4xbf16, #tpu.memory_space<vmem>>, vector<1x1x8x4xbf16>,
    %c0_158 = arith.constant 0 : index
    %c6 = arith.constant 6 : index
    %c0_159 = arith.constant 0 : index
    %c0_160 = arith.constant 0 : index
    %129 = vector.load %arg3[%c0_158, %c6, %c0_159, %c0_160] : memref<1x8x32x4xbf16, #tpu.memory_space<vmem>>, vector<1x1x32x4xbf16>
    %130 = vector.shape_cast %129 : vector<1x1x32x4xbf16> to vector<32x4xbf16>
    %cst_161 = arith.constant dense<0.000000e+00> : vector<8x4xf32>
    %131 = tpu.matmul %2, %130, %cst_161 {dimension_numbers = #tpu.dot_dimension_numbers<[1], [0], [0], [1], [0, 0, 1, 1], [], []>} : vector<8x32xbf16>, vector<32x4xbf16>, vector<8x4xf32> -> vector<8x4xf32>
    %132 = arith.truncf %131 : vector<8x4xf32> to vector<8x4xbf16>
    %c0_162 = arith.constant 0 : index
    %c6_163 = arith.constant 6 : index
    %c0_164 = arith.constant 0 : index
    %c0_165 = arith.constant 0 : index
    %133 = vector.load %arg6[%c0_162, %c6_163, %c0_164, %c0_165] : memref<1x8x8x4xbf16, #tpu.memory_space<vmem>>, vector<1x1x8x4xbf16>
    %134 = vector.shape_cast %133 : vector<1x1x8x4xbf16> to vector<8x4xbf16>
    %135 = vector.shape_cast %132 : vector<8x4xbf16> to vector<1x1x8x4xbf16>
    tpu.vector_store %arg6[%c0_162, %c6_163, %c0_164, %c0_165], %135 {strides = array<i32>} : memref<1x8x8x4xbf16, #tpu.memory_space<vmem>>, vector<1x1x8x4xbf16>,
    %c0_166 = arith.constant 0 : index
    %c6_167 = arith.constant 6 : index
    %c0_168 = arith.constant 0 : index
    %c0_169 = arith.constant 0 : index
    %136 = vector.load %arg4[%c0_166, %c6_167, %c0_168, %c0_169] : memref<1x8x32x4xbf16, #tpu.memory_space<vmem>>, vector<1x1x32x4xbf16>
    %137 = vector.shape_cast %136 : vector<1x1x32x4xbf16> to vector<32x4xbf16>
    %cst_170 = arith.constant dense<0.000000e+00> : vector<8x4xf32>
    %138 = tpu.matmul %2, %137, %cst_170 {dimension_numbers = #tpu.dot_dimension_numbers<[1], [0], [0], [1], [0, 0, 1, 1], [], []>} : vector<8x32xbf16>, vector<32x4xbf16>, vector<8x4xf32> -> vector<8x4xf32>
    %139 = arith.truncf %138 : vector<8x4xf32> to vector<8x4xbf16>
    %c0_171 = arith.constant 0 : index
    %c6_172 = arith.constant 6 : index
    %c0_173 = arith.constant 0 : index
    %c0_174 = arith.constant 0 : index
    %140 = vector.load %arg7[%c0_171, %c6_172, %c0_173, %c0_174] : memref<1x8x8x4xbf16, #tpu.memory_space<vmem>>, vector<1x1x8x4xbf16>
    %141 = vector.shape_cast %140 : vector<1x1x8x4xbf16> to vector<8x4xbf16>
    %142 = vector.shape_cast %139 : vector<8x4xbf16> to vector<1x1x8x4xbf16>
    tpu.vector_store %arg7[%c0_171, %c6_172, %c0_173, %c0_174], %142 {strides = array<i32>} : memref<1x8x8x4xbf16, #tpu.memory_space<vmem>>, vector<1x1x8x4xbf16>,
    %c0_175 = arith.constant 0 : index
    %c6_176 = arith.constant 6 : index
    %c0_177 = arith.constant 0 : index
    %c0_178 = arith.constant 0 : index
    %143 = vector.load %arg5[%c0_175, %c6_176, %c0_177, %c0_178] : memref<1x8x32x4xbf16, #tpu.memory_space<vmem>>, vector<1x1x32x4xbf16>
    %144 = vector.shape_cast %143 : vector<1x1x32x4xbf16> to vector<32x4xbf16>
    %cst_179 = arith.constant dense<0.000000e+00> : vector<8x4xf32>
    %145 = tpu.matmul %2, %144, %cst_179 {dimension_numbers = #tpu.dot_dimension_numbers<[1], [0], [0], [1], [0, 0, 1, 1], [], []>} : vector<8x32xbf16>, vector<32x4xbf16>, vector<8x4xf32> -> vector<8x4xf32>
    %146 = arith.truncf %145 : vector<8x4xf32> to vector<8x4xbf16>
    %c0_180 = arith.constant 0 : index
    %c6_181 = arith.constant 6 : index
    %c0_182 = arith.constant 0 : index
    %c0_183 = arith.constant 0 : index
    %147 = vector.load %arg8[%c0_180, %c6_181, %c0_182, %c0_183] : memref<1x8x8x4xbf16, #tpu.memory_space<vmem>>, vector<1x1x8x4xbf16>
    %148 = vector.shape_cast %147 : vector<1x1x8x4xbf16> to vector<8x4xbf16>
    %149 = vector.shape_cast %146 : vector<8x4xbf16> to vector<1x1x8x4xbf16>
    tpu.vector_store %arg8[%c0_180, %c6_181, %c0_182, %c0_183], %149 {strides = array<i32>} : memref<1x8x8x4xbf16, #tpu.memory_space<vmem>>, vector<1x1x8x4xbf16>,
    %c0_184 = arith.constant 0 : index
    %c7 = arith.constant 7 : index
    %c0_185 = arith.constant 0 : index
    %c0_186 = arith.constant 0 : index
    %150 = vector.load %arg3[%c0_184, %c7, %c0_185, %c0_186] : memref<1x8x32x4xbf16, #tpu.memory_space<vmem>>, vector<1x1x32x4xbf16>
    %151 = vector.shape_cast %150 : vector<1x1x32x4xbf16> to vector<32x4xbf16>
    %cst_187 = arith.constant dense<0.000000e+00> : vector<8x4xf32>
    %152 = tpu.matmul %2, %151, %cst_187 {dimension_numbers = #tpu.dot_dimension_numbers<[1], [0], [0], [1], [0, 0, 1, 1], [], []>} : vector<8x32xbf16>, vector<32x4xbf16>, vector<8x4xf32> -> vector<8x4xf32>
    %153 = arith.truncf %152 : vector<8x4xf32> to vector<8x4xbf16>
    %c0_188 = arith.constant 0 : index
    %c7_189 = arith.constant 7 : index
    %c0_190 = arith.constant 0 : index
    %c0_191 = arith.constant 0 : index
    %154 = vector.load %arg6[%c0_188, %c7_189, %c0_190, %c0_191] : memref<1x8x8x4xbf16, #tpu.memory_space<vmem>>, vector<1x1x8x4xbf16>
    %155 = vector.shape_cast %154 : vector<1x1x8x4xbf16> to vector<8x4xbf16>
    %156 = vector.shape_cast %153 : vector<8x4xbf16> to vector<1x1x8x4xbf16>
    tpu.vector_store %arg6[%c0_188, %c7_189, %c0_190, %c0_191], %156 {strides = array<i32>} : memref<1x8x8x4xbf16, #tpu.memory_space<vmem>>, vector<1x1x8x4xbf16>,
    %c0_192 = arith.constant 0 : index
    %c7_193 = arith.constant 7 : index
    %c0_194 = arith.constant 0 : index
    %c0_195 = arith.constant 0 : index
    %157 = vector.load %arg4[%c0_192, %c7_193, %c0_194, %c0_195] : memref<1x8x32x4xbf16, #tpu.memory_space<vmem>>, vector<1x1x32x4xbf16>
    %158 = vector.shape_cast %157 : vector<1x1x32x4xbf16> to vector<32x4xbf16>
    %cst_196 = arith.constant dense<0.000000e+00> : vector<8x4xf32>
    %159 = tpu.matmul %2, %158, %cst_196 {dimension_numbers = #tpu.dot_dimension_numbers<[1], [0], [0], [1], [0, 0, 1, 1], [], []>} : vector<8x32xbf16>, vector<32x4xbf16>, vector<8x4xf32> -> vector<8x4xf32>
    %160 = arith.truncf %159 : vector<8x4xf32> to vector<8x4xbf16>
    %c0_197 = arith.constant 0 : index
    %c7_198 = arith.constant 7 : index
    %c0_199 = arith.constant 0 : index
    %c0_200 = arith.constant 0 : index
    %161 = vector.load %arg7[%c0_197, %c7_198, %c0_199, %c0_200] : memref<1x8x8x4xbf16, #tpu.memory_space<vmem>>, vector<1x1x8x4xbf16>
    %162 = vector.shape_cast %161 : vector<1x1x8x4xbf16> to vector<8x4xbf16>
    %163 = vector.shape_cast %160 : vector<8x4xbf16> to vector<1x1x8x4xbf16>
    tpu.vector_store %arg7[%c0_197, %c7_198, %c0_199, %c0_200], %163 {strides = array<i32>} : memref<1x8x8x4xbf16, #tpu.memory_space<vmem>>, vector<1x1x8x4xbf16>,
    %c0_201 = arith.constant 0 : index
    %c7_202 = arith.constant 7 : index
    %c0_203 = arith.constant 0 : index
    %c0_204 = arith.constant 0 : index
    %164 = vector.load %arg5[%c0_201, %c7_202, %c0_203, %c0_204] : memref<1x8x32x4xbf16, #tpu.memory_space<vmem>>, vector<1x1x32x4xbf16>
    %165 = vector.shape_cast %164 : vector<1x1x32x4xbf16> to vector<32x4xbf16>
    %cst_205 = arith.constant dense<0.000000e+00> : vector<8x4xf32>
    %166 = tpu.matmul %2, %165, %cst_205 {dimension_numbers = #tpu.dot_dimension_numbers<[1], [0], [0], [1], [0, 0, 1, 1], [], []>} : vector<8x32xbf16>, vector<32x4xbf16>, vector<8x4xf32> -> vector<8x4xf32>
    %167 = arith.truncf %166 : vector<8x4xf32> to vector<8x4xbf16>
    %c0_206 = arith.constant 0 : index
    %c7_207 = arith.constant 7 : index
    %c0_208 = arith.constant 0 : index
    %c0_209 = arith.constant 0 : index
    %168 = vector.load %arg8[%c0_206, %c7_207, %c0_208, %c0_209] : memref<1x8x8x4xbf16, #tpu.memory_space<vmem>>, vector<1x1x8x4xbf16>
    %169 = vector.shape_cast %168 : vector<1x1x8x4xbf16> to vector<8x4xbf16>
    %170 = vector.shape_cast %167 : vector<8x4xbf16> to vector<1x1x8x4xbf16>
    tpu.vector_store %arg8[%c0_206, %c7_207, %c0_208, %c0_209], %170 {strides = array<i32>} : memref<1x8x8x4xbf16, #tpu.memory_space<vmem>>, vector<1x1x8x4xbf16>,
    return
  }
  func.func @transform_0(%arg0: i32, %arg1: i32) -> (i32, i32, i32) {
    %c0_i32 = arith.constant 0 : i32
    %c0_i32_0 = arith.constant 0 : i32
    %c0_i32_1 = arith.constant 0 : i32
    return %arg0, %c0_i32, %c0_i32_0 : i32, i32, i32
  }
  func.func @transform_1(%arg0: i32, %arg1: i32) -> (i32, i32, i32, i32) {
    %c0_i32 = arith.constant 0 : i32
    %c0_i32_0 = arith.constant 0 : i32
    %c0_i32_1 = arith.constant 0 : i32
    %c0_i32_2 = arith.constant 0 : i32
    return %arg1, %c0_i32, %c0_i32_0, %c0_i32_1 : i32, i32, i32, i32
  }
  func.func @transform_2(%arg0: i32, %arg1: i32) -> (i32, i32, i32, i32) {
    %c0_i32 = arith.constant 0 : i32
    %c0_i32_0 = arith.constant 0 : i32
    %c0_i32_1 = arith.constant 0 : i32
    %c0_i32_2 = arith.constant 0 : i32
    return %arg1, %c0_i32, %c0_i32_0, %c0_i32_1 : i32, i32, i32, i32
  }
  func.func @transform_3(%arg0: i32, %arg1: i32) -> (i32, i32, i32, i32) {
    %c0_i32 = arith.constant 0 : i32
    %c0_i32_0 = arith.constant 0 : i32
    %c0_i32_1 = arith.constant 0 : i32
    %c0_i32_2 = arith.constant 0 : i32
    return %arg1, %c0_i32, %c0_i32_0, %c0_i32_1 : i32, i32, i32, i32
  }
  func.func @transform_4(%arg0: i32, %arg1: i32) -> (i32, i32, i32, i32) {
    %c0_i32 = arith.constant 0 : i32
    %c0_i32_0 = arith.constant 0 : i32
    %c0_i32_1 = arith.constant 0 : i32
    return %arg0, %arg1, %c0_i32, %c0_i32_0 : i32, i32, i32, i32
  }
  func.func @transform_5(%arg0: i32, %arg1: i32) -> (i32, i32, i32, i32) {
    %c0_i32 = arith.constant 0 : i32
    %c0_i32_0 = arith.constant 0 : i32
    %c0_i32_1 = arith.constant 0 : i32
    return %arg0, %arg1, %c0_i32, %c0_i32_0 : i32, i32, i32, i32
  }
  func.func @transform_6(%arg0: i32, %arg1: i32) -> (i32, i32, i32, i32) {
    %c0_i32 = arith.constant 0 : i32
    %c0_i32_0 = arith.constant 0 : i32
    %c0_i32_1 = arith.constant 0 : i32
    return %arg0, %arg1, %c0_i32, %c0_i32_0 : i32, i32, i32, i32
  }
}

module attributes {stable_mosaic.version = 11 : i64} {
  func.func @flash_attn_kernel(%arg0: i32, %arg1: i32, %arg2: i32, %arg3: i32, %arg4: memref<1x8x8x4xbf16, #tpu.memory_space<vmem>>, %arg5: memref<1x8x8x4xbf16, #tpu.memory_space<vmem>>, %arg6: memref<1x8x8x4xbf16, #tpu.memory_space<vmem>>, %arg7: memref<1x8x8x4xbf16, #tpu.memory_space<vmem>>, %arg8: memref<8x8x1xf32, #tpu.memory_space<vmem>>, %arg9: memref<8x8x1xf32, #tpu.memory_space<vmem>>, %arg10: memref<8x8x4xf32, #tpu.memory_space<vmem>>) attributes {dimension_semantics = [#tpu.dimension_semantics<parallel>, #tpu.dimension_semantics<parallel>, #tpu.dimension_semantics<parallel>, #tpu.dimension_semantics<arbitrary>], iteration_bounds = array<i64: 2, 1, 1, 1>, scalar_prefetch = 0 : i64, scratch_operands = 3 : i64, tpu.core_type = #tpu.core_type<tc>, window_params = [{transform_indices = @transform_0, window_bounds = array<i64: 1, 8, 8, 4>}, {transform_indices = @transform_1, window_bounds = array<i64: 1, 8, 8, 4>}, {transform_indices = @transform_2, window_bounds = array<i64: 1, 8, 8, 4>}, {transform_indices = @transform_3, window_bounds = array<i64: 1, 8, 8, 4>}]} {
    %c0_i32 = arith.constant 0 : i32
    %0 = arith.cmpi eq, %arg3, %c0_i32 : i32
    %1 = arith.extui %0 : i1 to i32
    %c0_i32_0 = arith.constant 0 : i32
    %2 = arith.cmpi ne, %1, %c0_i32_0 : i32
    scf.if %2 {
      %cst_36 = arith.constant 0xFF800000 : f32
      %38 = vector.broadcast %cst_36 : f32 to vector<8x8x1xf32>
      %c0_37 = arith.constant 0 : index
      %c0_38 = arith.constant 0 : index
      %c0_39 = arith.constant 0 : index
      %39 = vector.load %arg8[%c0_37, %c0_38, %c0_39] : memref<8x8x1xf32, #tpu.memory_space<vmem>>, vector<8x8x1xf32>
      tpu.vector_store %arg8[%c0_37, %c0_38, %c0_39], %38 {strides = array<i32>} : memref<8x8x1xf32, #tpu.memory_space<vmem>>, vector<8x8x1xf32>,
      %cst_40 = arith.constant 0.000000e+00 : f32
      %40 = vector.broadcast %cst_40 : f32 to vector<8x8x1xf32>
      %c0_41 = arith.constant 0 : index
      %c0_42 = arith.constant 0 : index
      %c0_43 = arith.constant 0 : index
      %41 = vector.load %arg9[%c0_41, %c0_42, %c0_43] : memref<8x8x1xf32, #tpu.memory_space<vmem>>, vector<8x8x1xf32>
      tpu.vector_store %arg9[%c0_41, %c0_42, %c0_43], %40 {strides = array<i32>} : memref<8x8x1xf32, #tpu.memory_space<vmem>>, vector<8x8x1xf32>,
      %cst_44 = arith.constant 0.000000e+00 : f32
      %42 = vector.broadcast %cst_44 : f32 to vector<8x8x4xf32>
      %c0_45 = arith.constant 0 : index
      %c0_46 = arith.constant 0 : index
      %c0_47 = arith.constant 0 : index
      %43 = vector.load %arg10[%c0_45, %c0_46, %c0_47] : memref<8x8x4xf32, #tpu.memory_space<vmem>>, vector<8x8x4xf32>
      tpu.vector_store %arg10[%c0_45, %c0_46, %c0_47], %42 {strides = array<i32>} : memref<8x8x4xf32, #tpu.memory_space<vmem>>, vector<8x8x4xf32>,
    } else {
    }
    %c0 = arith.constant 0 : index
    %c0_1 = arith.constant 0 : index
    %c0_2 = arith.constant 0 : index
    %c0_3 = arith.constant 0 : index
    %3 = vector.load %arg4[%c0, %c0_1, %c0_2, %c0_3] : memref<1x8x8x4xbf16, #tpu.memory_space<vmem>>, vector<1x8x8x4xbf16>
    %4 = vector.shape_cast %3 : vector<1x8x8x4xbf16> to vector<8x8x4xbf16>
    %c0_4 = arith.constant 0 : index
    %c0_5 = arith.constant 0 : index
    %c0_6 = arith.constant 0 : index
    %c0_7 = arith.constant 0 : index
    %5 = vector.load %arg5[%c0_4, %c0_5, %c0_6, %c0_7] : memref<1x8x8x4xbf16, #tpu.memory_space<vmem>>, vector<1x8x8x4xbf16>
    %6 = vector.shape_cast %5 : vector<1x8x8x4xbf16> to vector<8x8x4xbf16>
    %c0_8 = arith.constant 0 : index
    %c0_9 = arith.constant 0 : index
    %c0_10 = arith.constant 0 : index
    %c0_11 = arith.constant 0 : index
    %7 = vector.load %arg6[%c0_8, %c0_9, %c0_10, %c0_11] : memref<1x8x8x4xbf16, #tpu.memory_space<vmem>>, vector<1x8x8x4xbf16>
    %8 = vector.shape_cast %7 : vector<1x8x8x4xbf16> to vector<8x8x4xbf16>
    "tpu.trace_start"() <{level = 10 : i32, message = "hqd,hkd->hqk"}> : () -> ()
    %cst = arith.constant dense<0.000000e+00> : vector<8x8x8xf32>
    %9 = tpu.matmul %4, %6, %cst {dimension_numbers = #tpu.dot_dimension_numbers<[2], [2], [1], [1], [0, 0, 0, 1, 1, 1], [0], [0]>} : vector<8x8x4xbf16>, vector<8x8x4xbf16>, vector<8x8x8xf32> -> vector<8x8x8xf32>
    "tpu.trace_stop"() : () -> ()
    %cst_12 = arith.constant 5.000000e-01 : f32
    %10 = vector.broadcast %cst_12 : f32 to vector<8x8x8xf32>
    %11 = arith.mulf %9, %10 : vector<8x8x8xf32>
    %c0_13 = arith.constant 0 : index
    %c0_14 = arith.constant 0 : index
    %c0_15 = arith.constant 0 : index
    %12 = vector.load %arg8[%c0_13, %c0_14, %c0_15] : memref<8x8x1xf32, #tpu.memory_space<vmem>>, vector<8x8x1xf32>
    %cst_16 = arith.constant dense<0xFF800000> : vector<8x8xf32>
    %13 = vector.multi_reduction <maximumf>, %11, %cst_16 [2] : vector<8x8x8xf32> to vector<8x8xf32>
    %14 = vector.shape_cast %13 : vector<8x8xf32> to vector<8x8x1xf32>
    %15 = arith.maximumf %12, %14 : vector<8x8x1xf32>
    %16 = arith.subf %12, %15 : vector<8x8x1xf32>
    %17 = math.exp %16 : vector<8x8x1xf32>
    %18 = vector.broadcast %15 : vector<8x8x1xf32> to vector<8x8x8xf32>
    %19 = arith.subf %11, %18 : vector<8x8x8xf32>
    %20 = math.exp %19 : vector<8x8x8xf32>
    %c0_17 = arith.constant 0 : index
    %c0_18 = arith.constant 0 : index
    %c0_19 = arith.constant 0 : index
    %21 = vector.load %arg9[%c0_17, %c0_18, %c0_19] : memref<8x8x1xf32, #tpu.memory_space<vmem>>, vector<8x8x1xf32>
    %22 = arith.mulf %17, %21 : vector<8x8x1xf32>
    %cst_20 = arith.constant dense<0.000000e+00> : vector<8x8xf32>
    %23 = vector.multi_reduction <add>, %20, %cst_20 [2] : vector<8x8x8xf32> to vector<8x8xf32>
    %24 = vector.shape_cast %23 : vector<8x8xf32> to vector<8x8x1xf32>
    %25 = arith.addf %22, %24 : vector<8x8x1xf32>
    %c0_21 = arith.constant 0 : index
    %c0_22 = arith.constant 0 : index
    %c0_23 = arith.constant 0 : index
    %26 = vector.load %arg9[%c0_21, %c0_22, %c0_23] : memref<8x8x1xf32, #tpu.memory_space<vmem>>, vector<8x8x1xf32>
    tpu.vector_store %arg9[%c0_21, %c0_22, %c0_23], %25 {strides = array<i32>} : memref<8x8x1xf32, #tpu.memory_space<vmem>>, vector<8x8x1xf32>,
    %c0_24 = arith.constant 0 : index
    %c0_25 = arith.constant 0 : index
    %c0_26 = arith.constant 0 : index
    %27 = vector.load %arg10[%c0_24, %c0_25, %c0_26] : memref<8x8x4xf32, #tpu.memory_space<vmem>>, vector<8x8x4xf32>
    %28 = vector.broadcast %17 : vector<8x8x1xf32> to vector<8x8x4xf32>
    %29 = arith.mulf %28, %27 : vector<8x8x4xf32>
    %30 = arith.truncf %20 : vector<8x8x8xf32> to vector<8x8x8xbf16>
    "tpu.trace_start"() <{level = 10 : i32, message = "hqk,hkd->hqd"}> : () -> ()
    %cst_27 = arith.constant dense<0.000000e+00> : vector<8x8x4xf32>
    %31 = tpu.matmul %30, %8, %cst_27 {dimension_numbers = #tpu.dot_dimension_numbers<[2], [1], [1], [2], [0, 0, 0, 1, 1, 2], [0], [0]>} : vector<8x8x8xbf16>, vector<8x8x4xbf16>, vector<8x8x4xf32> -> vector<8x8x4xf32>
    "tpu.trace_stop"() : () -> ()
    %32 = arith.addf %29, %31 : vector<8x8x4xf32>
    %c0_28 = arith.constant 0 : index
    %c0_29 = arith.constant 0 : index
    %c0_30 = arith.constant 0 : index
    %33 = vector.load %arg10[%c0_28, %c0_29, %c0_30] : memref<8x8x4xf32, #tpu.memory_space<vmem>>, vector<8x8x4xf32>
    tpu.vector_store %arg10[%c0_28, %c0_29, %c0_30], %32 {strides = array<i32>} : memref<8x8x4xf32, #tpu.memory_space<vmem>>, vector<8x8x4xf32>,
    %c0_31 = arith.constant 0 : index
    %c0_32 = arith.constant 0 : index
    %c0_33 = arith.constant 0 : index
    %34 = vector.load %arg8[%c0_31, %c0_32, %c0_33] : memref<8x8x1xf32, #tpu.memory_space<vmem>>, vector<8x8x1xf32>
    tpu.vector_store %arg8[%c0_31, %c0_32, %c0_33], %15 {strides = array<i32>} : memref<8x8x1xf32, #tpu.memory_space<vmem>>, vector<8x8x1xf32>,
    %c0_i32_34 = arith.constant 0 : i32
    %35 = arith.cmpi eq, %arg3, %c0_i32_34 : i32
    %36 = arith.extui %35 : i1 to i32
    %c0_i32_35 = arith.constant 0 : i32
    %37 = arith.cmpi ne, %36, %c0_i32_35 : i32
    scf.if %37 {
      %c0_36 = arith.constant 0 : index
      %c0_37 = arith.constant 0 : index
      %c0_38 = arith.constant 0 : index
      %38 = vector.load %arg9[%c0_36, %c0_37, %c0_38] : memref<8x8x1xf32, #tpu.memory_space<vmem>>, vector<8x8x1xf32>
      %39 = tpu.reciprocal %38 {approx = true} : vector<8x8x1xf32> -> vector<8x8x1xf32>
      %c0_39 = arith.constant 0 : index
      %c0_40 = arith.constant 0 : index
      %c0_41 = arith.constant 0 : index
      %40 = vector.load %arg10[%c0_39, %c0_40, %c0_41] : memref<8x8x4xf32, #tpu.memory_space<vmem>>, vector<8x8x4xf32>
      %41 = vector.broadcast %39 : vector<8x8x1xf32> to vector<8x8x4xf32>
      %42 = arith.mulf %40, %41 : vector<8x8x4xf32>
      %43 = arith.truncf %42 : vector<8x8x4xf32> to vector<8x8x4xbf16>
      %c0_42 = arith.constant 0 : index
      %c0_43 = arith.constant 0 : index
      %c0_44 = arith.constant 0 : index
      %c0_45 = arith.constant 0 : index
      %44 = vector.load %arg7[%c0_42, %c0_43, %c0_44, %c0_45] : memref<1x8x8x4xbf16, #tpu.memory_space<vmem>>, vector<1x8x8x4xbf16>
      %45 = vector.shape_cast %44 : vector<1x8x8x4xbf16> to vector<8x8x4xbf16>
      %46 = vector.shape_cast %43 : vector<8x8x4xbf16> to vector<1x8x8x4xbf16>
      tpu.vector_store %arg7[%c0_42, %c0_43, %c0_44, %c0_45], %46 {strides = array<i32>} : memref<1x8x8x4xbf16, #tpu.memory_space<vmem>>, vector<1x8x8x4xbf16>,
    } else {
    }
    return
  }
  func.func @transform_0(%arg0: i32, %arg1: i32, %arg2: i32, %arg3: i32) -> (i32, i32, i32, i32) {
    %c0_i32 = arith.constant 0 : i32
    %c0_i32_0 = arith.constant 0 : i32
    return %arg0, %arg1, %arg2, %c0_i32 : i32, i32, i32, i32
  }
  func.func @transform_1(%arg0: i32, %arg1: i32, %arg2: i32, %arg3: i32) -> (i32, i32, i32, i32) {
    %c0_i32 = arith.constant 0 : i32
    %c0_i32_0 = arith.constant 0 : i32
    return %arg0, %arg1, %arg3, %c0_i32 : i32, i32, i32, i32
  }
  func.func @transform_2(%arg0: i32, %arg1: i32, %arg2: i32, %arg3: i32) -> (i32, i32, i32, i32) {
    %c0_i32 = arith.constant 0 : i32
    %c0_i32_0 = arith.constant 0 : i32
    return %arg0, %arg1, %arg3, %c0_i32 : i32, i32, i32, i32
  }
  func.func @transform_3(%arg0: i32, %arg1: i32, %arg2: i32, %arg3: i32) -> (i32, i32, i32, i32) {
    %c0_i32 = arith.constant 0 : i32
    %c0_i32_0 = arith.constant 0 : i32
    return %arg0, %arg1, %arg2, %c0_i32 : i32, i32, i32, i32
  }
}

module attributes {stable_mosaic.version = 11 : i64} {
  func.func @proj_merge_kernel(%arg0: i32, %arg1: i32, %arg2: i32, %arg3: memref<1x8x8x4xbf16, #tpu.memory_space<vmem>>, %arg4: memref<1x8x4x32xbf16, #tpu.memory_space<vmem>>, %arg5: memref<1x32xf32, #tpu.memory_space<vmem>>, %arg6: memref<1x8x32xf32, #tpu.memory_space<vmem>>, %arg7: memref<8x32xf32, #tpu.memory_space<vmem>>) attributes {dimension_semantics = [#tpu.dimension_semantics<parallel>, #tpu.dimension_semantics<parallel>, #tpu.dimension_semantics<arbitrary>], iteration_bounds = array<i64: 2, 1, 1>, scalar_prefetch = 0 : i64, scratch_operands = 1 : i64, tpu.core_type = #tpu.core_type<tc>, window_params = [{transform_indices = @transform_0, window_bounds = array<i64: 1, 8, 8, 4>}, {transform_indices = @transform_1, window_bounds = array<i64: 1, 8, 4, 32>}, {pipeline_mode = #tpu.pipeline_mode<synchronous>, transform_indices = @transform_2, window_bounds = array<i64: 1, 32>}, {transform_indices = @transform_3, window_bounds = array<i64: 1, 8, 32>}]} {
    %c0_i32 = arith.constant 0 : i32
    %0 = arith.cmpi eq, %arg2, %c0_i32 : i32
    %1 = arith.extui %0 : i1 to i32
    %c0_i32_0 = arith.constant 0 : i32
    %2 = arith.cmpi ne, %1, %c0_i32_0 : i32
    scf.if %2 {
      %cst_70 = arith.constant 0.000000e+00 : f32
      %56 = vector.broadcast %cst_70 : f32 to vector<8x32xf32>
      %c0_71 = arith.constant 0 : index
      %c0_72 = arith.constant 0 : index
      %57 = vector.load %arg7[%c0_71, %c0_72] : memref<8x32xf32, #tpu.memory_space<vmem>>, vector<8x32xf32>
      tpu.vector_store %arg7[%c0_71, %c0_72], %56 {strides = array<i32>} : memref<8x32xf32, #tpu.memory_space<vmem>>, vector<8x32xf32>,
    } else {
    }
    %c0 = arith.constant 0 : index
    %c0_1 = arith.constant 0 : index
    %3 = vector.load %arg7[%c0, %c0_1] : memref<8x32xf32, #tpu.memory_space<vmem>>, vector<8x32xf32>
    %c0_2 = arith.constant 0 : index
    %c0_3 = arith.constant 0 : index
    %c0_4 = arith.constant 0 : index
    %c0_5 = arith.constant 0 : index
    %4 = vector.load %arg3[%c0_2, %c0_3, %c0_4, %c0_5] : memref<1x8x8x4xbf16, #tpu.memory_space<vmem>>, vector<1x1x8x4xbf16>
    %5 = vector.shape_cast %4 : vector<1x1x8x4xbf16> to vector<8x4xbf16>
    %c0_6 = arith.constant 0 : index
    %c0_7 = arith.constant 0 : index
    %c0_8 = arith.constant 0 : index
    %c0_9 = arith.constant 0 : index
    %6 = vector.load %arg4[%c0_6, %c0_7, %c0_8, %c0_9] : memref<1x8x4x32xbf16, #tpu.memory_space<vmem>>, vector<1x1x4x32xbf16>
    %7 = vector.shape_cast %6 : vector<1x1x4x32xbf16> to vector<4x32xbf16>
    %cst = arith.constant dense<0.000000e+00> : vector<8x32xf32>
    %8 = tpu.matmul %5, %7, %cst {dimension_numbers = #tpu.dot_dimension_numbers<[1], [0], [0], [1], [0, 0, 1, 1], [], []>} : vector<8x4xbf16>, vector<4x32xbf16>, vector<8x32xf32> -> vector<8x32xf32>
    %9 = arith.addf %3, %8 : vector<8x32xf32>
    %c0_10 = arith.constant 0 : index
    %c1 = arith.constant 1 : index
    %c0_11 = arith.constant 0 : index
    %c0_12 = arith.constant 0 : index
    %10 = vector.load %arg3[%c0_10, %c1, %c0_11, %c0_12] : memref<1x8x8x4xbf16, #tpu.memory_space<vmem>>, vector<1x1x8x4xbf16>
    %11 = vector.shape_cast %10 : vector<1x1x8x4xbf16> to vector<8x4xbf16>
    %c0_13 = arith.constant 0 : index
    %c1_14 = arith.constant 1 : index
    %c0_15 = arith.constant 0 : index
    %c0_16 = arith.constant 0 : index
    %12 = vector.load %arg4[%c0_13, %c1_14, %c0_15, %c0_16] : memref<1x8x4x32xbf16, #tpu.memory_space<vmem>>, vector<1x1x4x32xbf16>
    %13 = vector.shape_cast %12 : vector<1x1x4x32xbf16> to vector<4x32xbf16>
    %cst_17 = arith.constant dense<0.000000e+00> : vector<8x32xf32>
    %14 = tpu.matmul %11, %13, %cst_17 {dimension_numbers = #tpu.dot_dimension_numbers<[1], [0], [0], [1], [0, 0, 1, 1], [], []>} : vector<8x4xbf16>, vector<4x32xbf16>, vector<8x32xf32> -> vector<8x32xf32>
    %15 = arith.addf %9, %14 : vector<8x32xf32>
    %c0_18 = arith.constant 0 : index
    %c2 = arith.constant 2 : index
    %c0_19 = arith.constant 0 : index
    %c0_20 = arith.constant 0 : index
    %16 = vector.load %arg3[%c0_18, %c2, %c0_19, %c0_20] : memref<1x8x8x4xbf16, #tpu.memory_space<vmem>>, vector<1x1x8x4xbf16>
    %17 = vector.shape_cast %16 : vector<1x1x8x4xbf16> to vector<8x4xbf16>
    %c0_21 = arith.constant 0 : index
    %c2_22 = arith.constant 2 : index
    %c0_23 = arith.constant 0 : index
    %c0_24 = arith.constant 0 : index
    %18 = vector.load %arg4[%c0_21, %c2_22, %c0_23, %c0_24] : memref<1x8x4x32xbf16, #tpu.memory_space<vmem>>, vector<1x1x4x32xbf16>
    %19 = vector.shape_cast %18 : vector<1x1x4x32xbf16> to vector<4x32xbf16>
    %cst_25 = arith.constant dense<0.000000e+00> : vector<8x32xf32>
    %20 = tpu.matmul %17, %19, %cst_25 {dimension_numbers = #tpu.dot_dimension_numbers<[1], [0], [0], [1], [0, 0, 1, 1], [], []>} : vector<8x4xbf16>, vector<4x32xbf16>, vector<8x32xf32> -> vector<8x32xf32>
    %21 = arith.addf %15, %20 : vector<8x32xf32>
    %c0_26 = arith.constant 0 : index
    %c3 = arith.constant 3 : index
    %c0_27 = arith.constant 0 : index
    %c0_28 = arith.constant 0 : index
    %22 = vector.load %arg3[%c0_26, %c3, %c0_27, %c0_28] : memref<1x8x8x4xbf16, #tpu.memory_space<vmem>>, vector<1x1x8x4xbf16>
    %23 = vector.shape_cast %22 : vector<1x1x8x4xbf16> to vector<8x4xbf16>
    %c0_29 = arith.constant 0 : index
    %c3_30 = arith.constant 3 : index
    %c0_31 = arith.constant 0 : index
    %c0_32 = arith.constant 0 : index
    %24 = vector.load %arg4[%c0_29, %c3_30, %c0_31, %c0_32] : memref<1x8x4x32xbf16, #tpu.memory_space<vmem>>, vector<1x1x4x32xbf16>
    %25 = vector.shape_cast %24 : vector<1x1x4x32xbf16> to vector<4x32xbf16>
    %cst_33 = arith.constant dense<0.000000e+00> : vector<8x32xf32>
    %26 = tpu.matmul %23, %25, %cst_33 {dimension_numbers = #tpu.dot_dimension_numbers<[1], [0], [0], [1], [0, 0, 1, 1], [], []>} : vector<8x4xbf16>, vector<4x32xbf16>, vector<8x32xf32> -> vector<8x32xf32>
    %27 = arith.addf %21, %26 : vector<8x32xf32>
    %c0_34 = arith.constant 0 : index
    %c4 = arith.constant 4 : index
    %c0_35 = arith.constant 0 : index
    %c0_36 = arith.constant 0 : index
    %28 = vector.load %arg3[%c0_34, %c4, %c0_35, %c0_36] : memref<1x8x8x4xbf16, #tpu.memory_space<vmem>>, vector<1x1x8x4xbf16>
    %29 = vector.shape_cast %28 : vector<1x1x8x4xbf16> to vector<8x4xbf16>
    %c0_37 = arith.constant 0 : index
    %c4_38 = arith.constant 4 : index
    %c0_39 = arith.constant 0 : index
    %c0_40 = arith.constant 0 : index
    %30 = vector.load %arg4[%c0_37, %c4_38, %c0_39, %c0_40] : memref<1x8x4x32xbf16, #tpu.memory_space<vmem>>, vector<1x1x4x32xbf16>
    %31 = vector.shape_cast %30 : vector<1x1x4x32xbf16> to vector<4x32xbf16>
    %cst_41 = arith.constant dense<0.000000e+00> : vector<8x32xf32>
    %32 = tpu.matmul %29, %31, %cst_41 {dimension_numbers = #tpu.dot_dimension_numbers<[1], [0], [0], [1], [0, 0, 1, 1], [], []>} : vector<8x4xbf16>, vector<4x32xbf16>, vector<8x32xf32> -> vector<8x32xf32>
    %33 = arith.addf %27, %32 : vector<8x32xf32>
    %c0_42 = arith.constant 0 : index
    %c5 = arith.constant 5 : index
    %c0_43 = arith.constant 0 : index
    %c0_44 = arith.constant 0 : index
    %34 = vector.load %arg3[%c0_42, %c5, %c0_43, %c0_44] : memref<1x8x8x4xbf16, #tpu.memory_space<vmem>>, vector<1x1x8x4xbf16>
    %35 = vector.shape_cast %34 : vector<1x1x8x4xbf16> to vector<8x4xbf16>
    %c0_45 = arith.constant 0 : index
    %c5_46 = arith.constant 5 : index
    %c0_47 = arith.constant 0 : index
    %c0_48 = arith.constant 0 : index
    %36 = vector.load %arg4[%c0_45, %c5_46, %c0_47, %c0_48] : memref<1x8x4x32xbf16, #tpu.memory_space<vmem>>, vector<1x1x4x32xbf16>
    %37 = vector.shape_cast %36 : vector<1x1x4x32xbf16> to vector<4x32xbf16>
    %cst_49 = arith.constant dense<0.000000e+00> : vector<8x32xf32>
    %38 = tpu.matmul %35, %37, %cst_49 {dimension_numbers = #tpu.dot_dimension_numbers<[1], [0], [0], [1], [0, 0, 1, 1], [], []>} : vector<8x4xbf16>, vector<4x32xbf16>, vector<8x32xf32> -> vector<8x32xf32>
    %39 = arith.addf %33, %38 : vector<8x32xf32>
    %c0_50 = arith.constant 0 : index
    %c6 = arith.constant 6 : index
    %c0_51 = arith.constant 0 : index
    %c0_52 = arith.constant 0 : index
    %40 = vector.load %arg3[%c0_50, %c6, %c0_51, %c0_52] : memref<1x8x8x4xbf16, #tpu.memory_space<vmem>>, vector<1x1x8x4xbf16>
    %41 = vector.shape_cast %40 : vector<1x1x8x4xbf16> to vector<8x4xbf16>
    %c0_53 = arith.constant 0 : index
    %c6_54 = arith.constant 6 : index
    %c0_55 = arith.constant 0 : index
    %c0_56 = arith.constant 0 : index
    %42 = vector.load %arg4[%c0_53, %c6_54, %c0_55, %c0_56] : memref<1x8x4x32xbf16, #tpu.memory_space<vmem>>, vector<1x1x4x32xbf16>
    %43 = vector.shape_cast %42 : vector<1x1x4x32xbf16> to vector<4x32xbf16>
    %cst_57 = arith.constant dense<0.000000e+00> : vector<8x32xf32>
    %44 = tpu.matmul %41, %43, %cst_57 {dimension_numbers = #tpu.dot_dimension_numbers<[1], [0], [0], [1], [0, 0, 1, 1], [], []>} : vector<8x4xbf16>, vector<4x32xbf16>, vector<8x32xf32> -> vector<8x32xf32>
    %45 = arith.addf %39, %44 : vector<8x32xf32>
    %c0_58 = arith.constant 0 : index
    %c7 = arith.constant 7 : index
    %c0_59 = arith.constant 0 : index
    %c0_60 = arith.constant 0 : index
    %46 = vector.load %arg3[%c0_58, %c7, %c0_59, %c0_60] : memref<1x8x8x4xbf16, #tpu.memory_space<vmem>>, vector<1x1x8x4xbf16>
    %47 = vector.shape_cast %46 : vector<1x1x8x4xbf16> to vector<8x4xbf16>
    %c0_61 = arith.constant 0 : index
    %c7_62 = arith.constant 7 : index
    %c0_63 = arith.constant 0 : index
    %c0_64 = arith.constant 0 : index
    %48 = vector.load %arg4[%c0_61, %c7_62, %c0_63, %c0_64] : memref<1x8x4x32xbf16, #tpu.memory_space<vmem>>, vector<1x1x4x32xbf16>
    %49 = vector.shape_cast %48 : vector<1x1x4x32xbf16> to vector<4x32xbf16>
    %cst_65 = arith.constant dense<0.000000e+00> : vector<8x32xf32>
    %50 = tpu.matmul %47, %49, %cst_65 {dimension_numbers = #tpu.dot_dimension_numbers<[1], [0], [0], [1], [0, 0, 1, 1], [], []>} : vector<8x4xbf16>, vector<4x32xbf16>, vector<8x32xf32> -> vector<8x32xf32>
    %51 = arith.addf %45, %50 : vector<8x32xf32>
    %c0_66 = arith.constant 0 : index
    %c0_67 = arith.constant 0 : index
    %52 = vector.load %arg7[%c0_66, %c0_67] : memref<8x32xf32, #tpu.memory_space<vmem>>, vector<8x32xf32>
    tpu.vector_store %arg7[%c0_66, %c0_67], %51 {strides = array<i32>} : memref<8x32xf32, #tpu.memory_space<vmem>>, vector<8x32xf32>,
    %c0_i32_68 = arith.constant 0 : i32
    %53 = arith.cmpi eq, %arg2, %c0_i32_68 : i32
    %54 = arith.extui %53 : i1 to i32
    %c0_i32_69 = arith.constant 0 : i32
    %55 = arith.cmpi ne, %54, %c0_i32_69 : i32
    scf.if %55 {
      %c0_70 = arith.constant 0 : index
      %c0_71 = arith.constant 0 : index
      %56 = vector.load %arg7[%c0_70, %c0_71] : memref<8x32xf32, #tpu.memory_space<vmem>>, vector<8x32xf32>
      %c0_72 = arith.constant 0 : index
      %c0_73 = arith.constant 0 : index
      %57 = vector.load %arg5[%c0_72, %c0_73] : memref<1x32xf32, #tpu.memory_space<vmem>>, vector<1x32xf32>
      %58 = vector.broadcast %57 : vector<1x32xf32> to vector<8x32xf32>
      %59 = arith.addf %56, %58 : vector<8x32xf32>
      %c0_74 = arith.constant 0 : index
      %c0_75 = arith.constant 0 : index
      %c0_76 = arith.constant 0 : index
      %60 = vector.load %arg6[%c0_74, %c0_75, %c0_76] : memref<1x8x32xf32, #tpu.memory_space<vmem>>, vector<1x8x32xf32>
      %61 = vector.shape_cast %60 : vector<1x8x32xf32> to vector<8x32xf32>
      %62 = vector.shape_cast %59 : vector<8x32xf32> to vector<1x8x32xf32>
      tpu.vector_store %arg6[%c0_74, %c0_75, %c0_76], %62 {strides = array<i32>} : memref<1x8x32xf32, #tpu.memory_space<vmem>>, vector<1x8x32xf32>,
    } else {
    }
    return
  }
  func.func @transform_0(%arg0: i32, %arg1: i32, %arg2: i32) -> (i32, i32, i32, i32) {
    %c0_i32 = arith.constant 0 : i32
    %c0_i32_0 = arith.constant 0 : i32
    return %arg0, %arg2, %arg1, %c0_i32 : i32, i32, i32, i32
  }
  func.func @transform_1(%arg0: i32, %arg1: i32, %arg2: i32) -> (i32, i32, i32, i32) {
    %c0_i32 = arith.constant 0 : i32
    %c0_i32_0 = arith.constant 0 : i32
    %c0_i32_1 = arith.constant 0 : i32
    %c0_i32_2 = arith.constant 0 : i32
    return %arg2, %c0_i32, %c0_i32_0, %c0_i32_1 : i32, i32, i32, i32
  }
  func.func @transform_2(%arg0: i32, %arg1: i32, %arg2: i32) -> (i32, i32) {
    %c0_i32 = arith.constant 0 : i32
    %c0_i32_0 = arith.constant 0 : i32
    %c0_i32_1 = arith.constant 0 : i32
    return %c0_i32, %c0_i32_0 : i32, i32
  }
  func.func @transform_3(%arg0: i32, %arg1: i32, %arg2: i32) -> (i32, i32, i32) {
    %c0_i32 = arith.constant 0 : i32
    %c0_i32_0 = arith.constant 0 : i32
    return %arg0, %arg1, %c0_i32 : i32, i32, i32
  }
}

</mosaic_0001>

<bundles_post_ra>
// kernel: attention_forward.5
= control target key start
LH: loop header
LB: loop body
LE: loop exit
PB: predicated region body
PF: predicated region fallthrough
CT: control target
= control target key end

     0   :  { %8 = vsyncpa [#allocation4], 0  ;;  %s1241_s0 = inlined_call_operand.vmem [shape: bf16[2,8,8,4], index: 0, kind: input, shape index: {}]   ;;  %s1242_s1 = inlined_call_operand.vmem [shape: bf16[1,8,4,32], index: 1, kind: input, shape index: {}]   ;;  %s1243_s2 = inlined_call_operand.vmem [shape: f32[1,32], index: 2, kind: input, shape index: {}]   ;;  %s1244_s3 = inlined_call_operand.hbm [shape: f32[2,8,32], index: 3, kind: output, shape index: {}]  }
   0x1   :  { %10 = vsyncpa [#allocation4 + $0x1], 0  ;;  %s1065_s12 = smov 0   ;;  %s1067_s13 = smov 0  }
   0x2   :  { %s1069_s14 = smov 0   ;;  %s1071_s15 = smov 0  }
   0x3   :  { %s1073_s16 = smov 0   ;;  %s1075_s17 = smov 0  }
   0x4 LB: > { %s778_s18 = sadd.s32 4294967295, %s1040_s17   ;;  %s779_s19 = sadd.s32 4294967294, %s1040_s17   ;;  %s1040_s17 = sphi %s1075_s17, %s16_s17   ;;  %s1036_s16 = sphi %s1073_s16, %s1251_s16   ;;  %s1032_s15 = sphi %s1071_s15, %s1250_s15   ;;  %s1028_s14 = sphi %s1069_s14, %s1249_s14   ;;  %s1024_s13 = sphi %s1067_s13, %s1248_s13   ;;  %s1020_s12 = sphi %s1065_s12, %s1247_s12  }
   0x5   : > { %s35_s20 = sadd.s32 1, %s1036_s16  ;;  %s121_s21 = sadd.s32 1, %s1028_s14 }
   0x6   : > { %p37_p0 = scmp.ge.s32.totalorder %s35_s20, 2  ;;  %p131_p1 = scmp.ne.s32.totalorder %s1028_s14, %s1024_s13 }
   0x7   : > { %p132_p2 = scmp.eq.s32.totalorder %s778_s18, 1  ;;  %p137_p3 = scmp.ne.s32.totalorder %s1024_s13, %s1020_s12 }
   0x8   : > { %s1253_s20 = smov (%p37_p0, %s35_s20), 0  ;;  %p138_p5 = scmp.eq.s32.totalorder %s779_s19, 1 }
   0x9   : > { %p1105_p4 = por %p132_p2, %p131_p1  ;;  %s116_s23 = ssub.s32 %s1036_s16, %s1253_s20 }
   0xa   : > { %p783_p6 = scmp.ge.s32.totalorder %s1040_s17, 1  ;;  %p119_p7 = scmp.eq.s32.totalorder %s116_s23, 0 }
   0xb   : > { %p1112_p8 = por %p138_p5, %p137_p3  ;;  %p183_p9 = scmp.lt.s32.totalorder %s1040_s17, 3 }
   0xc   : > { %s1118_s25 = scalar_select %p119_p7, %s1028_s14, %s121_s21  }
   0xd   : > { %p184_p10 = pnand %p783_p6, %p183_p9 }
   0xe   : > { %v246_v0 = vld [vmem:[%s1242_s1] sm:$0x3] (!%p184_p10)  ;;  %vm251_vm0 = vcmask (!%p184_p10), 1041408   ;;  %v798_v1 = vld [vmem:[%s1242_s1 + $0x8] sm:$0x3] (!%p184_p10)  ;;  %v1042_v2 = vmov (!%p184_p10), 0.0  }
   0xf   : > { %187 = sbr.rel (%p184_p10) target bundleno = 303 (0x12f), region = 32  ;;  %831 = vmatprep.subr.bf16.mxu1 (!%p184_p10), %v1042_v2  ;;  %v253_v3 = vsel (!%p184_p10), %vm251_vm0, %v246_v0, 0  ;;  %855 = vmatprep.subr.bf16.mxu0 (!%p184_p10), %v1042_v2  ;;  %v457_v4 = vsel (!%p184_p10), %vm251_vm0, %v798_v1, 0  ;;  %p220_p11 = scmp.lt.s32.totalorder (!%p184_p10), %s1032_s15, 1  ;;  %vm1043_vm1 = vmmov (!%p184_p10), 0   ;;  %vm242_vm2 = vcmask (!%p184_p10), 261120  }
  0x10   : > { %832 = vmatpush3.bf16.msra.mxu1 (!%p184_p10), %v253_v3  ;;  %856 = vmatpush3.bf16.msra.mxu0 (!%p184_p10), %v457_v4  ;;  %v789_v5 = vld [vmem:[%s1242_s1 + $0x2] sm:$0x3] (!%p184_p10)  ;;  %v801_v6 = vld [vmem:[%s1242_s1 + $0xa] sm:$0x3] (!%p184_p10)  ;;  %vm247_vm3 = vcmask (!%p184_p10), 31744   ;;  %243 = vst.msk [vmem:[#allocation2] sm:$0xff] (!%p184_p10), %vm242_vm2, %v1042_v2 }
  0x11   : > { %833 = vmatprep.mubr.msk.bf16.mxu1 (!%p184_p10), %vm1043_vm1, %v1042_v2  ;;  %837 = vmatprep.subr.bf16.mxu1 (!%p184_p10), %v1042_v2  ;;  %v304_v7 = vsel (!%p184_p10), %vm251_vm0, %v789_v5, 0  ;;  %v508_v8 = vsel (!%p184_p10), %vm251_vm0, %v801_v6, 0  ;;  %v792_v11 = vld [vmem:[%s1242_s1 + $0x4] sm:$0x3] (!%p184_p10)  ;;  %v804_v12 = vld [vmem:[%s1242_s1 + $0xc] sm:$0x3] (!%p184_p10) }
  0x12   : > { %857 = vmatprep.mubr.msk.bf16.mxu0 (!%p184_p10), %vm1043_vm1, %v1042_v2  ;;  %861 = vmatprep.subr.bf16.mxu0 (!%p184_p10), %v1042_v2  ;;  %v355_v15 = vsel (!%p184_p10), %vm251_vm0, %v792_v11, 0  ;;  %v559_v16 = vsel (!%p184_p10), %vm251_vm0, %v804_v12, 0  ;;  %v795_v17 = vld [vmem:[%s1242_s1 + $0x6] sm:$0x3] (!%p184_p10)  ;;  %v807_v18 = vld [vmem:[%s1242_s1 + $0xe] sm:$0x3] (!%p184_p10) }
  0x13   : > { %v406_v21 = vsel (!%p184_p10), %vm251_vm0, %v795_v17, 0  ;;  %v610_v22 = vsel (!%p184_p10), %vm251_vm0, %v807_v18, 0  ;;  %v809_v36 = vld [vmem:[%s1243_s2] ss:$0 sm:$0xff] (!%p184_p10)  ;;  %s811_s7 = sshll.u32 (!%p184_p10), %s1032_s15, 7 }
  0x14   : > { %s1193_s18 = scalar_lea.hbm (!%p184_p10), %s1244_s3, %s811_s7 }
  0x16   : > { %s221_s30 = scalar_select %p220_p11, %s1032_s15, 1 }
  0x17   : > { %v244_v25 = vld [vmem:[#allocation2] sm:$0xff]  ;;  %s1044_s15 = smov [#allocation3]  }
  0x18   : > { %s814_s8 = sshll.u32 %s221_s30, 5  ;;  %s216_s30 = sand.u32 1, %s1024_s13  }
  0x19   : > { %s1142_s11 = scalar_lea.vmem %s1241_s0, %s814_s8  ;;  %s784_s4 = sshll.u32 %s216_s30, 3 }
  0x1a   : > { %v245_v9 = vld [vmem:[%s1142_s11] sm:$0xf]  ;;  %v797_v10 = vld [vmem:[%s1142_s11 + $0x10] sm:$0xf]  ;;  %v788_v13 = vld [vmem:[%s1142_s11 + $0x4] sm:$0xf] }
  0x1b   : > { %834 = vmatmul.mubr.msk.bf16.vlgmr.msra.gmra.mrb[0].mxu1 %vm247_vm3, %v245_v9  ;;  %858 = vmatmul.mubr.msk.bf16.vlgmr.msra.gmra.mrb[0].mxu0 %vm247_vm3, %v797_v10  ;;  %v800_v14 = vld [vmem:[%s1142_s11 + $0x14] sm:$0xf]  ;;  %v791_v19 = vld [vmem:[%s1142_s11 + $0x8] sm:$0xf]  ;;  %v803_v20 = vld [vmem:[%s1142_s11 + $0x18] sm:$0xf] }
  0x1c   : > { %838 = vmatpush3.bf16.msra.mxu1 %v304_v7  ;;  %862 = vmatpush3.bf16.msra.mxu0 %v508_v8  ;;  %v794_v23 = vld [vmem:[%s1142_s11 + $0xc] sm:$0xf]  ;;  %v806_v24 = vld [vmem:[%s1142_s11 + $0x1c] sm:$0xf]  ;;  %s218_s8 = scalar_lea.vmem [#allocation3], %s784_s4  ;;  %s669_s19 = scalar_lea.sflag [#allocation4], %s216_s30 }
  0x1d   : > { %839 = vmatprep.mubr.msk.bf16.mxu1 %vm1043_vm1, %v1042_v2  ;;  %843 = vmatprep.subr.bf16.mxu1 %v1042_v2  ;;  %s683_s9 = sshll.u32 %s218_s8, 4  ;;  %s966_s23 = sshll.u32 %s1044_s15, 4  ;;  %s1195_s9 = int_to_ptr.vmem [resolvable:$true] %s683_s9  ;;  %s967_s23 = int_to_ptr.vmem [resolvable:$false] %s966_s23 }
  0x1e   : > { %863 = vmatprep.mubr.msk.bf16.mxu0 %vm1043_vm1, %v1042_v2  ;;  %867 = vmatprep.subr.bf16.mxu0 %v1042_v2  ;;  %s962_s21 = scalar_lea.vmem %s1195_s9, 128  ;;  %s968_s26 = scalar_lea.vmem %s967_s23, 256 }
  0x1f   : > { %p963_p12 = scmp.ne.s32.totalorder %s1195_s9, %s962_s21  ;;  %p969_p1 = scmp.lt.s32.totalorder %s1195_s9, %s967_s23 }
  0x20   : > { %p970_p2 = scmp.lt.s32.totalorder %s968_s26, %s962_s21 }
  0x21   : > { %p964_p13 = pnand %p963_p12, %p1105_p4 }
  0x22   : > { %p971_p3 = por %p970_p2, %p969_p1 }
  0x23   : > { %p965_p0 = pneg %p964_p13 }
  0x25   : > { %p972_p5 = pnand %p971_p3, %p965_p0 }
  0x27   : > { %840 = vmatmul.mubr.msk.bf16.vlgmr.msra.gmra.mrb[0].mxu1 %vm247_vm3, %v788_v13  ;;  %864 = vmatmul.mubr.msk.bf16.vlgmr.msra.gmra.mrb[0].mxu0 %vm247_vm3, %v800_v14 }
  0x28   : > { %844 = vmatpush3.bf16.msra.mxu1 %v355_v15  ;;  %868 = vmatpush3.bf16.msra.mxu0 %v559_v16 }
  0x29   : > { %845 = vmatprep.mubr.msk.bf16.mxu1 %vm1043_vm1, %v1042_v2  ;;  %849 = vmatprep.subr.bf16.mxu1 %v1042_v2 }
  0x2a   : > { %869 = vmatprep.mubr.msk.bf16.mxu0 %vm1043_vm1, %v1042_v2  ;;  %873 = vmatprep.subr.bf16.mxu0 %v1042_v2 }
  0x33   : > { %846 = vmatmul.mubr.msk.bf16.vlgmr.msra.gmra.mrb[0].mxu1 %vm247_vm3, %v791_v19  ;;  %870 = vmatmul.mubr.msk.bf16.vlgmr.msra.gmra.mrb[0].mxu0 %vm247_vm3, %v803_v20 }
  0x34   : > { %850 = vmatpush3.bf16.msra.mxu1 %v406_v21  ;;  %874 = vmatpush3.bf16.msra.mxu0 %v610_v22 }
  0x35   : > { %851 = vmatprep.mubr.msk.bf16.mxu1 %vm1043_vm1, %v1042_v2  ;;  %875 = vmatprep.mubr.msk.bf16.mxu0 %vm1043_vm1, %v1042_v2 }
  0x3f   : > { %852 = vmatmul.mubr.msk.bf16.vlgmr.msra.gmra.mrb[0].mxu1 %vm247_vm3, %v794_v23  ;;  %876 = vmatmul.mubr.msk.bf16.vlgmr.msra.gmra.mrb[0].mxu0 %vm247_vm3, %v806_v24 }
 0x112   : > { %v442_v26 = vpop.f32.mrb[0].mxu1  ;;  %v646_v27 = vpop.f32.mrb[0].mxu0 }
 0x113   : > { %v879_v28 = vadd.f32 %v442_v26, %v244_v25  ;;  %v853_v29 = vpop.f32.mrb[1].mxu1  ;;  %v877_v30 = vpop.f32.mrb[1].mxu0 }
 0x114   : > { %v445_v31 = vpop.f32.mrb[2].mxu1  ;;  %v649_v32 = vpop.f32.mrb[2].mxu0 }
 0x115   : > { %v880_v33 = vadd.f32 %v879_v28, %v646_v27  ;;  %v854_v34 = vpop.f32.mrb[3].mxu1  ;;  %v878_v35 = vpop.f32.mrb[3].mxu0 }
 0x117   : > { %654 = vst.msk [vmem:[#allocation2] sm:$0xff] %vm242_vm2, %v880_v33 }
 0x11e   : > { %v658_v37 = vld [vmem:[#allocation2] sm:$0xff] }
 0x11f   : > { %v666_v38 = vadd.f32 %v809_v36, %v658_v37 }
 0x121   : > { %667 = vst.msk [vmem:[%s218_s8] sm:$0xff] %vm242_vm2, %v666_v38 }
 0x122   : > { %975 = shalt.err (!%p972_p5)
}
 0x123   : > { %s976_s27 = scalar_lea.hbm %s1193_s18, 128  ;;  %s980_s30 = scalar_lea.hbm %s1244_s3, 256 }
 0x124   : > { %p977_p6 = scmp.ne.s32.totalorder %s1193_s18, %s976_s27  ;;  %p981_p10 = scmp.lt.u32.totalorder %s1193_s18, %s1244_s3 }
 0x125   : > { %p982_p11 = scmp.lt.u32.totalorder %s980_s30, %s976_s27  ;;  %p984_p13 = scmp.lt.u32.totalorder %s976_s27, %s1193_s18 }
 0x126   : > { %p978_p7 = pnand %p977_p6, %p1105_p4 }
 0x127   : > { %p983_p12 = por %p982_p11, %p981_p10 }
 0x128   : > { %p979_p9 = pneg %p978_p7 }
 0x129   : > { %p985_p0 = por %p984_p13, %p983_p12 }
 0x12b   : > { %p986_p1 = pnand %p985_p0, %p979_p9 }
 0x12d   : > { %989 = shalt.err (!%p986_p1)
}
 0x12e   : > { %905 = dma.vmem_to_hbm [thread:$0]  (%p1105_p4), %s1195_s9, 128, %s1193_s18, %s669_s19  }
 0x12f PF: > { %p911_p2 = scmp.ge.s32.totalorder %s1040_s17, 2  ;;  %s695_s6 = sand.u32 1, %s1020_s12  }
 0x130   : > { %s696_s7 = scalar_lea.sflag [#allocation4], %s695_s6 }
 0x131   : > { %p908_p3 = pnand %p911_p2, %p1112_p8 }
 0x133   : > { %1015 = dma.done.wait (!%p908_p3), %s696_s7, 128  }
 0x134   : > { %1017 = vsyncadd (!%p908_p3), %s696_s7, 4294967168  ;;  %s16_s17 = sadd.s32 1, %s1040_s17   ;;  %s1247_s12 = smov %s1024_s13 }
 0x135   : > { %p13_p5 = scmp.ge.s32.totalorder %s16_s17, 4   ;;  %s1248_s13 = smov %s1028_s14 }
 0x136   : > { %s1249_s14 = smov %s1118_s25  ;;  %s1250_s15 = smov %s1036_s16 }
 0x137   : > { %s1251_s16 = smov %s1253_s20  ;;  %15 = sbr.rel (!%p13_p5) target bundleno = 4 (0x4), region = 92 }
 0x13e   :  { %701 = vsyncpa [#allocation4], 1 }
 0x13f   :  { %703 = vsyncpa [#allocation4 + $0x1], 1 }

// kernel: attention_forward.3
= control target key start
LH: loop header
LB: loop body
LE: loop exit
PB: predicated region body
PF: predicated region fallthrough
CT: control target
= control target key end

     0   :  { %s2643_s21 = smov 0   ;;  %s2645_s22 = smov 0   ;;  %s3030_s0 = inlined_call_operand.vmem [shape: f32[2,8,32], index: 0, kind: input, shape index: {}]   ;;  %s3031_s1 = inlined_call_operand.vmem [shape: bf16[1,8,32,4], index: 1, kind: input, shape index: {}]   ;;  %s3032_s2 = inlined_call_operand.vmem [shape: bf16[1,8,32,4], index: 2, kind: input, shape index: {}]   ;;  %s3033_s3 = inlined_call_operand.vmem [shape: bf16[1,8,32,4], index: 3, kind: input, shape index: {}]   ;;  %s3034_s4 = inlined_call_operand.vmem [shape: bf16[2,8,8,4], index: 4, kind: output, shape index: {0}]   ;;  %s3035_s5 = inlined_call_operand.vmem [shape: bf16[2,8,8,4], index: 5, kind: output, shape index: {1}]   ;;  %s3036_s6 = inlined_call_operand.vmem [shape: bf16[2,8,8,4], index: 6, kind: output, shape index: {2}]  }
   0x1   :  { %s2647_s23 = smov 0  }
   0x2 LB: > { %s29_s24 = sadd.s32 1, %s2600_s22  ;;  %p2054_p0 = scmp.ge.s32.totalorder %s2604_s23, 1  ;;  %s2604_s23 = sphi %s2647_s23, %s17_s23   ;;  %s2600_s22 = sphi %s2645_s22, %s3038_s22   ;;  %s2596_s21 = sphi %s2643_s21, %s3037_s21  }
   0x3   : > { %p31_p1 = scmp.ge.s32.totalorder %s29_s24, 2  ;;  %p264_p2 = scmp.lt.s32.totalorder %s2604_s23, 3 }
   0x5   : > { %s3040_s24 = smov (%p31_p1, %s29_s24), 0  ;;  %p265_p3 = pnand %p2054_p0, %p264_p2 }
   0x6   : > { %v2534_v0 = vld [vmem:[%s3031_s1] sm:$0xff] (!%p265_p3)   ;;  %v2606_v1 = vmov (!%p265_p3), 0.0   ;;  %v2536_v3 = vld [vmem:[%s3031_s1 + $0x8] sm:$0xff] (!%p265_p3)   ;;  %vm2607_vm0 = vmmov (!%p265_p3), 0   ;;  %p330_p4 = scmp.lt.s32.totalorder (!%p265_p3), %s2596_s21, 1  ;;  %v2539_v6 = vld [vmem:[%s3031_s1 + $0x10] sm:$0xff] (!%p265_p3)  }
   0x7   : > { %268 = sbr.rel (%p265_p3) target bundleno = 323 (0x143), region = 36  ;;  %2316 = vmatprep.subr.bf16.mxu0 (!%p265_p3), %v2606_v1  ;;  %2324 = vmatprep.subr.bf16.mxu1 (!%p265_p3), %v2606_v1  ;;  %v2535_v2 = vld [vmem:[%s3032_s2] sm:$0xff] (!%p265_p3)   ;;  %v2537_v4 = vld [vmem:[%s3032_s2 + $0x8] sm:$0xff] (!%p265_p3)   ;;  %vm398_vm1 = vcmask (!%p265_p3), 261120   ;;  %v2541_v10 = vld [vmem:[%s3031_s1 + $0x18] sm:$0xff] (!%p265_p3)   ;;  %vm443_vm2 = vcmask (!%p265_p3), 27648  }
   0x8   : > { %2317 = vmatpush3.bf16.msra.mxu0 (!%p265_p3), %v2534_v0  ;;  %2320 = vmatprep.mubr.msk.bf16.mxu0 (!%p265_p3), %vm2607_vm0, %v2606_v1  ;;  %v2538_v5 = vld [vmem:[%s3033_s3] sm:$0xff] (!%p265_p3)   ;;  %v2540_v9 = vld [vmem:[%s3033_s3 + $0x8] sm:$0xff] (!%p265_p3)   ;;  %v2542_v11 = vld [vmem:[%s3032_s2 + $0x10] sm:$0xff] (!%p265_p3)  }
   0x9   : > { %2325 = vmatpush3.bf16.msra.mxu1 (!%p265_p3), %v2535_v2  ;;  %2318 = vmatprep.subr.bf16.mxu0 (!%p265_p3), %v2606_v1  ;;  %v2543_v12 = vld [vmem:[%s3033_s3 + $0x10] sm:$0xff] (!%p265_p3)   ;;  %v2544_v13 = vld [vmem:[%s3032_s2 + $0x18] sm:$0xff] (!%p265_p3)   ;;  %v2546_v15 = vld [vmem:[%s3031_s1 + $0x20] sm:$0xff] (!%p265_p3)  }
   0xa   : > { %2326 = vmatprep.subr.bf16.mxu1 (!%p265_p3), %v2606_v1  ;;  %2328 = vmatprep.mubr.msk.bf16.mxu1 (!%p265_p3), %vm2607_vm0, %v2606_v1  ;;  %v2545_v14 = vld [vmem:[%s3033_s3 + $0x18] sm:$0xff] (!%p265_p3)   ;;  %v2547_v16 = vld [vmem:[%s3032_s2 + $0x20] sm:$0xff] (!%p265_p3)   ;;  %v2548_v17 = vld [vmem:[%s3031_s1 + $0x28] sm:$0xff] (!%p265_p3)  }
   0xb   : > { %v2549_v18 = vld [vmem:[%s3032_s2 + $0x28] sm:$0xff] (!%p265_p3)   ;;  %v2550_v19 = vld [vmem:[%s3033_s3 + $0x20] sm:$0xff] (!%p265_p3)   ;;  %v2551_v20 = vld [vmem:[%s3031_s1 + $0x30] sm:$0xff] (!%p265_p3)  }
   0xc   : > { %2319 = vmatpush3.bf16.msra.mxu0 (!%p265_p3), %v2536_v3  ;;  %v2552_v21 = vld [vmem:[%s3033_s3 + $0x28] sm:$0xff] (!%p265_p3)   ;;  %v2553_v22 = vld [vmem:[%s3031_s1 + $0x38] sm:$0xff] (!%p265_p3)   ;;  %v2554_v23 = vld [vmem:[%s3032_s2 + $0x30] sm:$0xff] (!%p265_p3)  }
   0xd   : > { %2327 = vmatpush3.bf16.msra.mxu1 (!%p265_p3), %v2537_v4  ;;  %2332 = vmatprep.subr.bf16.mxu0 (!%p265_p3), %v2606_v1  ;;  %v2555_v24 = vld [vmem:[%s3033_s3 + $0x30] sm:$0xff] (!%p265_p3)   ;;  %v2556_v25 = vld [vmem:[%s3032_s2 + $0x38] sm:$0xff] (!%p265_p3)   ;;  %v2558_v27 = vld [vmem:[%s3031_s1 + $0x40] sm:$0xff] (!%p265_p3)  }
   0xe   : > { %s3042_s21 = smov (!%p330_p4, %s2596_s21), 1  ;;  %2340 = vmatprep.subr.bf16.mxu1 %v2606_v1  ;;  %v2557_v26 = vld [vmem:[%s3033_s3 + $0x38] sm:$0xff]   ;;  %v2559_v28 = vld [vmem:[%s3032_s2 + $0x40] sm:$0xff]   ;;  %v2560_v29 = vld [vmem:[%s3031_s1 + $0x48] sm:$0xff]  }
   0xf   : > { %s2055_s9 = sshll.u32 %s3042_s21, 3  ;;  %v2561_v30 = vld [vmem:[%s3032_s2 + $0x48] sm:$0xff]   ;;  %v2562_v31 = vld [vmem:[%s3033_s3 + $0x40] sm:$0xff]   ;;  %v2563_v32 = vld [vmem:[%s3031_s1 + $0x50] sm:$0xff]   ;;  %s2241_s25 = sshll.u32 %s3042_s21, 5 }
  0x10   : > { %s333_s14 = scalar_lea.vmem %s3030_s0, %s2055_s9  ;;  %v2564_v33 = vld [vmem:[%s3033_s3 + $0x48] sm:$0xff]   ;;  %v2565_v34 = vld [vmem:[%s3031_s1 + $0x58] sm:$0xff]   ;;  %v2566_v35 = vld [vmem:[%s3032_s2 + $0x50] sm:$0xff]   ;;  %s2961_s28 = scalar_lea.vmem %s3034_s4, %s2241_s25 }
  0x11   : > { %v380_v7 = vld [vmem:[%s333_s14] sm:$0xff]  ;;  %v2567_v36 = vld [vmem:[%s3033_s3 + $0x50] sm:$0xff]   ;;  %v2568_v37 = vld [vmem:[%s3032_s2 + $0x58] sm:$0xff]   ;;  %s2966_s7 = scalar_lea.vmem %s3035_s5, %s2241_s25  ;;  %s2975_s9 = scalar_lea.vmem %s3036_s6, %s2241_s25 }
  0x12   : > { %v2695_v8 = vpack.c.bf16 %v380_v7, %v380_v7  ;;  %v2569_v38 = vld [vmem:[%s3033_s3 + $0x58] sm:$0xff]   ;;  %v2570_v39 = vld [vmem:[%s3031_s1 + $0x60] sm:$0xff]   ;;  %v2572_v41 = vld [vmem:[%s3031_s1 + $0x68] sm:$0xff]  }
  0x13   : > { %v2571_v40 = vld [vmem:[%s3032_s2 + $0x60] sm:$0xff]   ;;  %v2573_v42 = vld [vmem:[%s3032_s2 + $0x68] sm:$0xff]   ;;  %v2575_v44 = vld [vmem:[%s3031_s1 + $0x70] sm:$0xff]  }
  0x14   : > { %2321 = vmatmul.mubr.msk.bf16.vlgmr.msra.gmra.mrb[0].mxu0 %vm398_vm1, %v2695_v8  ;;  %2329 = vmatmul.mubr.msk.bf16.vlgmr.msra.gmra.mrb[0].mxu1 %vm398_vm1, %v2695_v8  ;;  %v2574_v43 = vld [vmem:[%s3033_s3 + $0x60] sm:$0xff]   ;;  %v2576_v45 = vld [vmem:[%s3033_s3 + $0x68] sm:$0xff]   ;;  %v2577_v46 = vld [vmem:[%s3031_s1 + $0x78] sm:$0xff]  }
  0x15   : > { %2333 = vmatpush3.bf16.msra.mxu0 %v2538_v5  ;;  %2341 = vmatpush3.bf16.msra.mxu1 %v2539_v6  ;;  %v2578_v47 = vld [vmem:[%s3032_s2 + $0x70] sm:$0xff]   ;;  %v2580_v49 = vld [vmem:[%s3032_s2 + $0x78] sm:$0xff]  }
  0x16   : > { %2334 = vmatprep.subr.bf16.mxu0 %v2606_v1  ;;  %2342 = vmatprep.subr.bf16.mxu1 %v2606_v1  ;;  %v2579_v48 = vld [vmem:[%s3033_s3 + $0x70] sm:$0xff]   ;;  %v2581_v50 = vld [vmem:[%s3033_s3 + $0x78] sm:$0xff]  }
  0x17   : > { %2336 = vmatprep.mubr.msk.bf16.mxu0 %vm2607_vm0, %v2606_v1  ;;  %2344 = vmatprep.mubr.msk.bf16.mxu1 %vm2607_vm0, %v2606_v1 }
  0x19   : > { %2335 = vmatpush3.bf16.msra.mxu0 %v2540_v9  ;;  %2343 = vmatpush3.bf16.msra.mxu1 %v2541_v10 }
  0x1a   : > { %2348 = vmatprep.subr.bf16.mxu0 %v2606_v1  ;;  %2356 = vmatprep.subr.bf16.mxu1 %v2606_v1 }
  0x1c   : > { %2337 = vmatmul.mubr.msk.bf16.vlgmr.msra.gmra.mrb[4].mxu0 %vm398_vm1, %v2695_v8  ;;  %2345 = vmatmul.mubr.msk.bf16.vlgmr.msra.gmra.mrb[4].mxu1 %vm398_vm1, %v2695_v8 }
  0x1d   : > { %2349 = vmatpush3.bf16.msra.mxu0 %v2542_v11  ;;  %2357 = vmatpush3.bf16.msra.mxu1 %v2543_v12 }
  0x1e   : > { %2350 = vmatprep.subr.bf16.mxu0 %v2606_v1  ;;  %2358 = vmatprep.subr.bf16.mxu1 %v2606_v1 }
  0x1f   : > { %2352 = vmatprep.mubr.msk.bf16.mxu0 %vm2607_vm0, %v2606_v1  ;;  %2360 = vmatprep.mubr.msk.bf16.mxu1 %vm2607_vm0, %v2606_v1 }
  0x21   : > { %2351 = vmatpush3.bf16.msra.mxu0 %v2544_v13  ;;  %2359 = vmatpush3.bf16.msra.mxu1 %v2545_v14 }
  0x22   : > { %2364 = vmatprep.subr.bf16.mxu0 %v2606_v1  ;;  %2372 = vmatprep.subr.bf16.mxu1 %v2606_v1 }
  0x24   : > { %2353 = vmatmul.mubr.msk.bf16.vlgmr.msra.gmra.mrb[8].mxu0 %vm398_vm1, %v2695_v8  ;;  %2361 = vmatmul.mubr.msk.bf16.vlgmr.msra.gmra.mrb[8].mxu1 %vm398_vm1, %v2695_v8 }
  0x25   : > { %2365 = vmatpush3.bf16.msra.mxu0 %v2546_v15  ;;  %2373 = vmatpush3.bf16.msra.mxu1 %v2547_v16 }
  0x26   : > { %2366 = vmatprep.subr.bf16.mxu0 %v2606_v1  ;;  %2374 = vmatprep.subr.bf16.mxu1 %v2606_v1 }
  0x27   : > { %2368 = vmatprep.mubr.msk.bf16.mxu0 %vm2607_vm0, %v2606_v1  ;;  %2376 = vmatprep.mubr.msk.bf16.mxu1 %vm2607_vm0, %v2606_v1 }
  0x29   : > { %2367 = vmatpush3.bf16.msra.mxu0 %v2548_v17  ;;  %2375 = vmatpush3.bf16.msra.mxu1 %v2549_v18 }
  0x2a   : > { %2380 = vmatprep.subr.bf16.mxu0 %v2606_v1  ;;  %2388 = vmatprep.subr.bf16.mxu1 %v2606_v1 }
  0x2c   : > { %2369 = vmatmul.mubr.msk.bf16.vlgmr.msra.gmra.mrb[12].mxu0 %vm398_vm1, %v2695_v8  ;;  %2377 = vmatmul.mubr.msk.bf16.vlgmr.msra.gmra.mrb[12].mxu1 %vm398_vm1, %v2695_v8 }
  0x2d   : > { %2381 = vmatpush3.bf16.msra.mxu0 %v2550_v19  ;;  %2389 = vmatpush3.bf16.msra.mxu1 %v2551_v20 }
  0x2e   : > { %2382 = vmatprep.subr.bf16.mxu0 %v2606_v1  ;;  %2390 = vmatprep.subr.bf16.mxu1 %v2606_v1 }
  0x2f   : > { %2384 = vmatprep.mubr.msk.bf16.mxu0 %vm2607_vm0, %v2606_v1  ;;  %2392 = vmatprep.mubr.msk.bf16.mxu1 %vm2607_vm0, %v2606_v1 }
  0x31   : > { %2383 = vmatpush3.bf16.msra.mxu0 %v2552_v21  ;;  %2391 = vmatpush3.bf16.msra.mxu1 %v2553_v22 }
  0x32   : > { %2396 = vmatprep.subr.bf16.mxu0 %v2606_v1  ;;  %2404 = vmatprep.subr.bf16.mxu1 %v2606_v1 }
  0x34   : > { %2385 = vmatmul.mubr.msk.bf16.vlgmr.msra.gmra.mrb[16].mxu0 %vm398_vm1, %v2695_v8  ;;  %2393 = vmatmul.mubr.msk.bf16.vlgmr.msra.gmra.mrb[16].mxu1 %vm398_vm1, %v2695_v8 }
  0x35   : > { %2397 = vmatpush3.bf16.msra.mxu0 %v2554_v23  ;;  %2405 = vmatpush3.bf16.msra.mxu1 %v2555_v24 }
  0x36   : > { %2398 = vmatprep.subr.bf16.mxu0 %v2606_v1  ;;  %2406 = vmatprep.subr.bf16.mxu1 %v2606_v1 }
  0x37   : > { %2400 = vmatprep.mubr.msk.bf16.mxu0 %vm2607_vm0, %v2606_v1  ;;  %2408 = vmatprep.mubr.msk.bf16.mxu1 %vm2607_vm0, %v2606_v1 }
  0x39   : > { %2399 = vmatpush3.bf16.msra.mxu0 %v2556_v25  ;;  %2407 = vmatpush3.bf16.msra.mxu1 %v2557_v26 }
  0x3a   : > { %2412 = vmatprep.subr.bf16.mxu0 %v2606_v1  ;;  %2420 = vmatprep.subr.bf16.mxu1 %v2606_v1 }
  0x3c   : > { %2401 = vmatmul.mubr.msk.bf16.vlgmr.msra.gmra.mrb[20].mxu0 %vm398_vm1, %v2695_v8  ;;  %2409 = vmatmul.mubr.msk.bf16.vlgmr.msra.gmra.mrb[20].mxu1 %vm398_vm1, %v2695_v8 }
  0x3d   : > { %2413 = vmatpush3.bf16.msra.mxu0 %v2558_v27  ;;  %2421 = vmatpush3.bf16.msra.mxu1 %v2559_v28 }
  0x3e   : > { %2414 = vmatprep.subr.bf16.mxu0 %v2606_v1  ;;  %2422 = vmatprep.subr.bf16.mxu1 %v2606_v1 }
  0x3f   : > { %2416 = vmatprep.mubr.msk.bf16.mxu0 %vm2607_vm0, %v2606_v1  ;;  %2424 = vmatprep.mubr.msk.bf16.mxu1 %vm2607_vm0, %v2606_v1 }
  0x41   : > { %2415 = vmatpush3.bf16.msra.mxu0 %v2560_v29  ;;  %2423 = vmatpush3.bf16.msra.mxu1 %v2561_v30 }
  0x42   : > { %2428 = vmatprep.subr.bf16.mxu0 %v2606_v1  ;;  %2436 = vmatprep.subr.bf16.mxu1 %v2606_v1 }
  0x44   : > { %2417 = vmatmul.mubr.msk.bf16.vlgmr.msra.gmra.mrb[24].mxu0 %vm398_vm1, %v2695_v8  ;;  %2425 = vmatmul.mubr.msk.bf16.vlgmr.msra.gmra.mrb[24].mxu1 %vm398_vm1, %v2695_v8 }
  0x45   : > { %2429 = vmatpush3.bf16.msra.mxu0 %v2562_v31  ;;  %2437 = vmatpush3.bf16.msra.mxu1 %v2563_v32 }
  0x46   : > { %2430 = vmatprep.subr.bf16.mxu0 %v2606_v1  ;;  %2438 = vmatprep.subr.bf16.mxu1 %v2606_v1 }
  0x47   : > { %2432 = vmatprep.mubr.msk.bf16.mxu0 %vm2607_vm0, %v2606_v1  ;;  %2440 = vmatprep.mubr.msk.bf16.mxu1 %vm2607_vm0, %v2606_v1 }
  0x49   : > { %2431 = vmatpush3.bf16.msra.mxu0 %v2564_v33  ;;  %2439 = vmatpush3.bf16.msra.mxu1 %v2565_v34 }
  0x4a   : > { %2444 = vmatprep.subr.bf16.mxu0 %v2606_v1  ;;  %2452 = vmatprep.subr.bf16.mxu1 %v2606_v1 }
  0x4c   : > { %2433 = vmatmul.mubr.msk.bf16.vlgmr.msra.gmra.mrb[28].mxu0 %vm398_vm1, %v2695_v8  ;;  %2441 = vmatmul.mubr.msk.bf16.vlgmr.msra.gmra.mrb[28].mxu1 %vm398_vm1, %v2695_v8 }
  0x4d   : > { %2445 = vmatpush3.bf16.msra.mxu0 %v2566_v35  ;;  %2453 = vmatpush3.bf16.msra.mxu1 %v2567_v36 }
  0x4e   : > { %2446 = vmatprep.subr.bf16.mxu0 %v2606_v1  ;;  %2454 = vmatprep.subr.bf16.mxu1 %v2606_v1 }
  0x4f   : > { %2448 = vmatprep.mubr.msk.bf16.mxu0 %vm2607_vm0, %v2606_v1  ;;  %2456 = vmatprep.mubr.msk.bf16.mxu1 %vm2607_vm0, %v2606_v1 }
  0x51   : > { %2447 = vmatpush3.bf16.msra.mxu0 %v2568_v37  ;;  %2455 = vmatpush3.bf16.msra.mxu1 %v2569_v38 }
  0x52   : > { %2460 = vmatprep.subr.bf16.mxu0 %v2606_v1  ;;  %2468 = vmatprep.subr.bf16.mxu1 %v2606_v1 }
  0x54   : > { %2449 = vmatmul.mubr.msk.bf16.vlgmr.msra.gmra.mrb[32].mxu0 %vm398_vm1, %v2695_v8  ;;  %2457 = vmatmul.mubr.msk.bf16.vlgmr.msra.gmra.mrb[32].mxu1 %vm398_vm1, %v2695_v8 }
  0x55   : > { %2461 = vmatpush3.bf16.msra.mxu0 %v2570_v39  ;;  %2469 = vmatpush3.bf16.msra.mxu1 %v2571_v40 }
  0x56   : > { %2462 = vmatprep.subr.bf16.mxu0 %v2606_v1  ;;  %2470 = vmatprep.subr.bf16.mxu1 %v2606_v1 }
  0x57   : > { %2464 = vmatprep.mubr.msk.bf16.mxu0 %vm2607_vm0, %v2606_v1  ;;  %2472 = vmatprep.mubr.msk.bf16.mxu1 %vm2607_vm0, %v2606_v1 }
  0x59   : > { %2463 = vmatpush3.bf16.msra.mxu0 %v2572_v41  ;;  %2471 = vmatpush3.bf16.msra.mxu1 %v2573_v42 }
  0x5a   : > { %2476 = vmatprep.subr.bf16.mxu0 %v2606_v1  ;;  %2484 = vmatprep.subr.bf16.mxu1 %v2606_v1 }
  0x5c   : > { %2465 = vmatmul.mubr.msk.bf16.vlgmr.msra.gmra.mrb[36].mxu0 %vm398_vm1, %v2695_v8  ;;  %2473 = vmatmul.mubr.msk.bf16.vlgmr.msra.gmra.mrb[36].mxu1 %vm398_vm1, %v2695_v8 }
  0x5d   : > { %2477 = vmatpush3.bf16.msra.mxu0 %v2574_v43  ;;  %2485 = vmatpush3.bf16.msra.mxu1 %v2575_v44 }
  0x5e   : > { %2478 = vmatprep.subr.bf16.mxu0 %v2606_v1  ;;  %2486 = vmatprep.subr.bf16.mxu1 %v2606_v1 }
  0x5f   : > { %2480 = vmatprep.mubr.msk.bf16.mxu0 %vm2607_vm0, %v2606_v1  ;;  %2488 = vmatprep.mubr.msk.bf16.mxu1 %vm2607_vm0, %v2606_v1 }
  0x61   : > { %2479 = vmatpush3.bf16.msra.mxu0 %v2576_v45  ;;  %2487 = vmatpush3.bf16.msra.mxu1 %v2577_v46 }
  0x62   : > { %2492 = vmatprep.subr.bf16.mxu0 %v2606_v1  ;;  %2500 = vmatprep.subr.bf16.mxu1 %v2606_v1 }
  0x64   : > { %2481 = vmatmul.mubr.msk.bf16.vlgmr.msra.gmra.mrb[40].mxu0 %vm398_vm1, %v2695_v8  ;;  %2489 = vmatmul.mubr.msk.bf16.vlgmr.msra.gmra.mrb[40].mxu1 %vm398_vm1, %v2695_v8 }
  0x65   : > { %2493 = vmatpush3.bf16.msra.mxu0 %v2578_v47  ;;  %2501 = vmatpush3.bf16.msra.mxu1 %v2579_v48 }
  0x66   : > { %2494 = vmatprep.subr.bf16.mxu0 %v2606_v1  ;;  %2502 = vmatprep.subr.bf16.mxu1 %v2606_v1 }
  0x67   : > { %2496 = vmatprep.mubr.msk.bf16.mxu0 %vm2607_vm0, %v2606_v1  ;;  %2504 = vmatprep.mubr.msk.bf16.mxu1 %vm2607_vm0, %v2606_v1 }
  0x69   : > { %2495 = vmatpush3.bf16.msra.mxu0 %v2580_v49  ;;  %2503 = vmatpush3.bf16.msra.mxu1 %v2581_v50 }
  0x6c   : > { %2497 = vmatmul.mubr.msk.bf16.vlgmr.msra.gmra.mrb[44].mxu0 %vm398_vm1, %v2695_v8  ;;  %2505 = vmatmul.mubr.msk.bf16.vlgmr.msra.gmra.mrb[44].mxu1 %vm398_vm1, %v2695_v8 }
  0xe7   : > { %v436_v51 = vpop.f32.mrb[0].mxu0  ;;  %v495_v52 = vpop.f32.mrb[0].mxu1 }
  0xe8   : > { %v442_v53 = vpack.c.bf16 %v436_v51, %v436_v51  ;;  %v501_v54 = vpack.c.bf16 %v495_v52, %v495_v52  ;;  %v2322_v55 = vpop.f32.mrb[1].mxu0  ;;  %v2330_v56 = vpop.f32.mrb[1].mxu1 }
  0xe9   : > { %v439_v57 = vpop.f32.mrb[2].mxu0  ;;  %v498_v58 = vpop.f32.mrb[2].mxu1 }
  0xea   : > { %444 = vst.msk [vmem:[%s2961_s28] sm:$0xf] %vm443_vm2, %v442_v53  ;;  %502 = vst.msk [vmem:[%s2966_s7] sm:$0xf] %vm443_vm2, %v501_v54  ;;  %v2323_v59 = vpop.f32.mrb[3].mxu0  ;;  %v2331_v60 = vpop.f32.mrb[3].mxu1 }
  0xef   : > { %v553_v61 = vpop.f32.mrb[4].mxu0  ;;  %v612_v62 = vpop.f32.mrb[4].mxu1 }
  0xf0   : > { %v559_v63 = vpack.c.bf16 %v553_v61, %v553_v61  ;;  %v618_v0 = vpack.c.bf16 %v612_v62, %v612_v62  ;;  %v2338_v1 = vpop.f32.mrb[5].mxu0  ;;  %v2346_v2 = vpop.f32.mrb[5].mxu1 }
  0xf1   : > { %v556_v3 = vpop.f32.mrb[6].mxu0  ;;  %v615_v4 = vpop.f32.mrb[6].mxu1 }
  0xf2   : > { %560 = vst.msk [vmem:[%s2975_s9] sm:$0xf] %vm443_vm2, %v559_v63  ;;  %2078 = vst.msk [vmem:[%s2961_s28 + $0x4] sm:$0xf] %vm443_vm2, %v618_v0  ;;  %v2339_v5 = vpop.f32.mrb[7].mxu0  ;;  %v2347_v6 = vpop.f32.mrb[7].mxu1 }
  0xf7   : > { %v672_v7 = vpop.f32.mrb[8].mxu0  ;;  %v732_v8 = vpop.f32.mrb[8].mxu1 }
  0xf8   : > { %v678_v9 = vpack.c.bf16 %v672_v7, %v672_v7  ;;  %v738_v10 = vpack.c.bf16 %v732_v8, %v732_v8  ;;  %v2354_v11 = vpop.f32.mrb[9].mxu0  ;;  %v2362_v12 = vpop.f32.mrb[9].mxu1 }
  0xf9   : > { %v675_v13 = vpop.f32.mrb[10].mxu0  ;;  %v735_v14 = vpop.f32.mrb[10].mxu1 }
  0xfa   : > { %2086 = vst.msk [vmem:[%s2966_s7 + $0x4] sm:$0xf] %vm443_vm2, %v678_v9  ;;  %2094 = vst.msk [vmem:[%s2975_s9 + $0x4] sm:$0xf] %vm443_vm2, %v738_v10  ;;  %v2355_v15 = vpop.f32.mrb[11].mxu0  ;;  %v2363_v16 = vpop.f32.mrb[11].mxu1 }
  0xff   : > { %v792_v17 = vpop.f32.mrb[12].mxu0  ;;  %v852_v18 = vpop.f32.mrb[12].mxu1 }
 0x100   : > { %v798_v19 = vpack.c.bf16 %v792_v17, %v792_v17  ;;  %v858_v20 = vpack.c.bf16 %v852_v18, %v852_v18  ;;  %v2370_v21 = vpop.f32.mrb[13].mxu0  ;;  %v2378_v22 = vpop.f32.mrb[13].mxu1 }
 0x101   : > { %v795_v23 = vpop.f32.mrb[14].mxu0  ;;  %v855_v24 = vpop.f32.mrb[14].mxu1 }
 0x102   : > { %2102 = vst.msk [vmem:[%s2961_s28 + $0x8] sm:$0xf] %vm443_vm2, %v798_v19  ;;  %2110 = vst.msk [vmem:[%s2966_s7 + $0x8] sm:$0xf] %vm443_vm2, %v858_v20  ;;  %v2371_v25 = vpop.f32.mrb[15].mxu0  ;;  %v2379_v26 = vpop.f32.mrb[15].mxu1 }
 0x107   : > { %v912_v27 = vpop.f32.mrb[16].mxu0  ;;  %v972_v28 = vpop.f32.mrb[16].mxu1 }
 0x108   : > { %v918_v29 = vpack.c.bf16 %v912_v27, %v912_v27  ;;  %v978_v30 = vpack.c.bf16 %v972_v28, %v972_v28  ;;  %v2386_v31 = vpop.f32.mrb[17].mxu0  ;;  %v2394_v32 = vpop.f32.mrb[17].mxu1 }
 0x109   : > { %v915_v33 = vpop.f32.mrb[18].mxu0  ;;  %v975_v34 = vpop.f32.mrb[18].mxu1 }
 0x10a   : > { %2118 = vst.msk [vmem:[%s2975_s9 + $0x8] sm:$0xf] %vm443_vm2, %v918_v29  ;;  %2126 = vst.msk [vmem:[%s2961_s28 + $0xc] sm:$0xf] %vm443_vm2, %v978_v30  ;;  %v2387_v35 = vpop.f32.mrb[19].mxu0  ;;  %v2395_v36 = vpop.f32.mrb[19].mxu1 }
 0x10f   : > { %v1032_v37 = vpop.f32.mrb[20].mxu0  ;;  %v1092_v38 = vpop.f32.mrb[20].mxu1 }
 0x110   : > { %v1038_v39 = vpack.c.bf16 %v1032_v37, %v1032_v37  ;;  %v1098_v40 = vpack.c.bf16 %v1092_v38, %v1092_v38  ;;  %v2402_v41 = vpop.f32.mrb[21].mxu0  ;;  %v2410_v42 = vpop.f32.mrb[21].mxu1 }
 0x111   : > { %v1035_v43 = vpop.f32.mrb[22].mxu0  ;;  %v1095_v44 = vpop.f32.mrb[22].mxu1 }
 0x112   : > { %2134 = vst.msk [vmem:[%s2966_s7 + $0xc] sm:$0xf] %vm443_vm2, %v1038_v39  ;;  %2142 = vst.msk [vmem:[%s2975_s9 + $0xc] sm:$0xf] %vm443_vm2, %v1098_v40  ;;  %v2403_v45 = vpop.f32.mrb[23].mxu0  ;;  %v2411_v46 = vpop.f32.mrb[23].mxu1 }
 0x117   : > { %v1152_v47 = vpop.f32.mrb[24].mxu0  ;;  %v1212_v48 = vpop.f32.mrb[24].mxu1 }
 0x118   : > { %v1158_v49 = vpack.c.bf16 %v1152_v47, %v1152_v47  ;;  %v1218_v50 = vpack.c.bf16 %v1212_v48, %v1212_v48  ;;  %v2418_v51 = vpop.f32.mrb[25].mxu0  ;;  %v2426_v52 = vpop.f32.mrb[25].mxu1 }
 0x119   : > { %v1155_v53 = vpop.f32.mrb[26].mxu0  ;;  %v1215_v54 = vpop.f32.mrb[26].mxu1 }
 0x11a   : > { %2150 = vst.msk [vmem:[%s2961_s28 + $0x10] sm:$0xf] %vm443_vm2, %v1158_v49  ;;  %2158 = vst.msk [vmem:[%s2966_s7 + $0x10] sm:$0xf] %vm443_vm2, %v1218_v50  ;;  %v2419_v55 = vpop.f32.mrb[27].mxu0  ;;  %v2427_v56 = vpop.f32.mrb[27].mxu1 }
 0x11f   : > { %v1272_v57 = vpop.f32.mrb[28].mxu0  ;;  %v1332_v58 = vpop.f32.mrb[28].mxu1 }
 0x120   : > { %v1278_v59 = vpack.c.bf16 %v1272_v57, %v1272_v57  ;;  %v1338_v60 = vpack.c.bf16 %v1332_v58, %v1332_v58  ;;  %v2434_v61 = vpop.f32.mrb[29].mxu0  ;;  %v2442_v62 = vpop.f32.mrb[29].mxu1 }
 0x121   : > { %v1275_v63 = vpop.f32.mrb[30].mxu0  ;;  %v1335_v0 = vpop.f32.mrb[30].mxu1 }
 0x122   : > { %2166 = vst.msk [vmem:[%s2975_s9 + $0x10] sm:$0xf] %vm443_vm2, %v1278_v59  ;;  %2174 = vst.msk [vmem:[%s2961_s28 + $0x14] sm:$0xf] %vm443_vm2, %v1338_v60  ;;  %v2435_v1 = vpop.f32.mrb[31].mxu0  ;;  %v2443_v2 = vpop.f32.mrb[31].mxu1 }
 0x127   : > { %v1392_v3 = vpop.f32.mrb[32].mxu0  ;;  %v1452_v4 = vpop.f32.mrb[32].mxu1 }
 0x128   : > { %v1398_v5 = vpack.c.bf16 %v1392_v3, %v1392_v3  ;;  %v1458_v6 = vpack.c.bf16 %v1452_v4, %v1452_v4  ;;  %v2450_v7 = vpop.f32.mrb[33].mxu0  ;;  %v2458_v8 = vpop.f32.mrb[33].mxu1 }
 0x129   : > { %v1395_v9 = vpop.f32.mrb[34].mxu0  ;;  %v1455_v10 = vpop.f32.mrb[34].mxu1 }
 0x12a   : > { %2182 = vst.msk [vmem:[%s2966_s7 + $0x14] sm:$0xf] %vm443_vm2, %v1398_v5  ;;  %2190 = vst.msk [vmem:[%s2975_s9 + $0x14] sm:$0xf] %vm443_vm2, %v1458_v6  ;;  %v2451_v11 = vpop.f32.mrb[35].mxu0  ;;  %v2459_v12 = vpop.f32.mrb[35].mxu1 }
 0x12f   : > { %v1512_v13 = vpop.f32.mrb[36].mxu0  ;;  %v1572_v14 = vpop.f32.mrb[36].mxu1 }
 0x130   : > { %v1518_v15 = vpack.c.bf16 %v1512_v13, %v1512_v13  ;;  %v1578_v16 = vpack.c.bf16 %v1572_v14, %v1572_v14  ;;  %v2466_v17 = vpop.f32.mrb[37].mxu0  ;;  %v2474_v18 = vpop.f32.mrb[37].mxu1 }
 0x131   : > { %v1515_v19 = vpop.f32.mrb[38].mxu0  ;;  %v1575_v20 = vpop.f32.mrb[38].mxu1 }
 0x132   : > { %2198 = vst.msk [vmem:[%s2961_s28 + $0x18] sm:$0xf] %vm443_vm2, %v1518_v15  ;;  %2206 = vst.msk [vmem:[%s2966_s7 + $0x18] sm:$0xf] %vm443_vm2, %v1578_v16  ;;  %v2467_v21 = vpop.f32.mrb[39].mxu0  ;;  %v2475_v22 = vpop.f32.mrb[39].mxu1 }
 0x137   : > { %v1632_v23 = vpop.f32.mrb[40].mxu0  ;;  %v1692_v24 = vpop.f32.mrb[40].mxu1 }
 0x138   : > { %v1638_v25 = vpack.c.bf16 %v1632_v23, %v1632_v23  ;;  %v1698_v26 = vpack.c.bf16 %v1692_v24, %v1692_v24  ;;  %v2482_v27 = vpop.f32.mrb[41].mxu0  ;;  %v2490_v28 = vpop.f32.mrb[41].mxu1 }
 0x139   : > { %v1635_v29 = vpop.f32.mrb[42].mxu0  ;;  %v1695_v30 = vpop.f32.mrb[42].mxu1 }
 0x13a   : > { %2214 = vst.msk [vmem:[%s2975_s9 + $0x18] sm:$0xf] %vm443_vm2, %v1638_v25  ;;  %2222 = vst.msk [vmem:[%s2961_s28 + $0x1c] sm:$0xf] %vm443_vm2, %v1698_v26  ;;  %v2483_v31 = vpop.f32.mrb[43].mxu0  ;;  %v2491_v32 = vpop.f32.mrb[43].mxu1 }
 0x13f   : > { %v1752_v33 = vpop.f32.mrb[44].mxu0  ;;  %v1812_v34 = vpop.f32.mrb[44].mxu1 }
 0x140   : > { %v1758_v35 = vpack.c.bf16 %v1752_v33, %v1752_v33  ;;  %v1818_v36 = vpack.c.bf16 %v1812_v34, %v1812_v34  ;;  %v2498_v37 = vpop.f32.mrb[45].mxu0  ;;  %v2506_v38 = vpop.f32.mrb[45].mxu1 }
 0x141   : > { %v1755_v39 = vpop.f32.mrb[46].mxu0  ;;  %v1815_v40 = vpop.f32.mrb[46].mxu1 }
 0x142   : > { %2230 = vst.msk [vmem:[%s2966_s7 + $0x1c] sm:$0xf] %vm443_vm2, %v1758_v35  ;;  %2238 = vst.msk [vmem:[%s2975_s9 + $0x1c] sm:$0xf] %vm443_vm2, %v1818_v36  ;;  %v2499_v41 = vpop.f32.mrb[47].mxu0  ;;  %v2507_v42 = vpop.f32.mrb[47].mxu1 }
 0x143 PF: > { %s17_s23 = sadd.s32 1, %s2604_s23   ;;  %s3037_s21 = smov %s2600_s22 }
 0x144   : > { %p14_p5 = scmp.ge.s32.totalorder %s17_s23, 4   ;;  %s3038_s22 = smov %s3040_s24 }
 0x146   :  { %16 = sbr.rel (!%p14_p5) target bundleno = 2 (0x2), region = 141 }

// kernel: attention_forward.4
= control target key start
LH: loop header
LB: loop body
LE: loop exit
PB: predicated region body
PF: predicated region fallthrough
CT: control target
= control target key end

     0   :  { %s1941_s12 = smov 0   ;;  %s1943_s13 = smov 0   ;;  %s2331_s0 = inlined_call_operand.vmem [shape: bf16[2,8,8,4], index: 0, kind: input, shape index: {}]   ;;  %s2332_s1 = inlined_call_operand.vmem [shape: bf16[2,8,8,4], index: 1, kind: input, shape index: {}]   ;;  %s2333_s2 = inlined_call_operand.vmem [shape: bf16[2,8,8,4], index: 2, kind: input, shape index: {}]   ;;  %s2334_s3 = inlined_call_operand.vmem [shape: bf16[2,8,8,4], index: 3, kind: output, shape index: {}]  }
   0x1   :  { %s1945_s14 = smov 0  }
   0x2 LB: > { %s39_s15 = sadd.s32 1, %s1911_s13  ;;  %p1656_p0 = scmp.ge.s32.totalorder %s1915_s14, 1  ;;  %s1915_s14 = sphi %s1945_s14, %s13_s14   ;;  %s1911_s13 = sphi %s1943_s13, %s2336_s13   ;;  %s1907_s12 = sphi %s1941_s12, %s2335_s12  }
   0x3   : > { %p41_p1 = scmp.ge.s32.totalorder %s39_s15, 2  ;;  %p223_p2 = scmp.lt.s32.totalorder %s1915_s14, 3 }
   0x5   : > { %s2338_s15 = smov (%p41_p1, %s39_s15), 0  ;;  %p224_p3 = pnand %p1656_p0, %p223_p2 }
   0x6   : > { %p286_p4 = scmp.lt.s32.totalorder (!%p224_p3), %s1907_s12, 1  ;;  %vm359_vm0 = vcmask (!%p224_p3), 31744   ;;  %v1917_v0 = vmov (!%p224_p3), 0.0   ;;  %vm1918_vm1 = vmmov (!%p224_p3), 0   ;;  %vm342_vm2 = vcmask (!%p224_p3), 7168  }
   0x7   : > { %227 = sbr.rel (%p224_p3) target bundleno = 853 (0x355), region = 32  ;;  %1719 = vmatprep.subr.bf16.mxu0 (!%p224_p3), %v1917_v0  ;;  %360 = vst.msk [vmem:[#allocation4] sm:$0xff] (!%p224_p3), %vm359_vm0, %v1917_v0  ;;  %361 = vst.msk [vmem:[#allocation4 + $0x8] sm:$0xff] (!%p224_p3), %vm359_vm0, %v1917_v0  ;;  %1725 = vmatprep.subr.bf16.mxu1 (!%p224_p3), %v1917_v0  ;;  %v1919_v25 = vmov (!%p224_p3), -inf   ;;  %vm777_vm3 = vcmask (!%p224_p3), 64512   ;;  %v1920_v62 = vmov (!%p224_p3), 0  }
   0x8   : > { %362 = vst.msk [vmem:[#allocation4 + $0x10] sm:$0xff] (!%p224_p3), %vm359_vm0, %v1917_v0  ;;  %363 = vst.msk [vmem:[#allocation4 + $0x18] sm:$0xff] (!%p224_p3), %vm359_vm0, %v1917_v0  ;;  %1721 = vmatprep.mubr.msk.bf16.mxu0 (!%p224_p3), %vm1918_vm1, %v1917_v0  ;;  %1727 = vmatprep.mubr.msk.bf16.mxu1 (!%p224_p3), %vm1918_vm1, %v1917_v0  ;;  %vm1022_vm4 = vcmask (!%p224_p3), 1043456   ;;  %vm1495_vm5 = vcmask (!%p224_p3), 27648  }
   0x9   : > { %364 = vst.msk [vmem:[#allocation4 + $0x20] sm:$0xff] (!%p224_p3), %vm359_vm0, %v1917_v0  ;;  %365 = vst.msk [vmem:[#allocation4 + $0x28] sm:$0xff] (!%p224_p3), %vm359_vm0, %v1917_v0  ;;  %1843 = vset.pattern.permute.xlu0 (!%p224_p3), %v1920_v62  ;;  %1844 = vset.pattern.permute.xlu1 (!%p224_p3), %v1920_v62 }
   0xa   : > { %366 = vst.msk [vmem:[#allocation4 + $0x30] sm:$0xff] (!%p224_p3), %vm359_vm0, %v1917_v0  ;;  %367 = vst.msk [vmem:[#allocation4 + $0x38] sm:$0xff] (!%p224_p3), %vm359_vm0, %v1917_v0 }
   0xb   : > { %343 = vst.msk [vmem:[#allocation2] sm:$0xff] (!%p224_p3), %vm342_vm2, %v1919_v25  ;;  %344 = vst.msk [vmem:[#allocation2 + $0x8] sm:$0xff] (!%p224_p3), %vm342_vm2, %v1919_v25 }
   0xc   : > { %345 = vst.msk [vmem:[#allocation2 + $0x10] sm:$0xff] (!%p224_p3), %vm342_vm2, %v1919_v25  ;;  %346 = vst.msk [vmem:[#allocation2 + $0x18] sm:$0xff] (!%p224_p3), %vm342_vm2, %v1919_v25 }
   0xd   : > { %347 = vst.msk [vmem:[#allocation2 + $0x20] sm:$0xff] (!%p224_p3), %vm342_vm2, %v1919_v25  ;;  %348 = vst.msk [vmem:[#allocation2 + $0x28] sm:$0xff] (!%p224_p3), %vm342_vm2, %v1919_v25 }
   0xe   : > { %s2340_s12 = smov (!%p286_p4, %s1907_s12), 1  ;;  %349 = vst.msk [vmem:[#allocation2 + $0x30] sm:$0xff] %vm342_vm2, %v1919_v25  ;;  %350 = vst.msk [vmem:[#allocation2 + $0x38] sm:$0xff] %vm342_vm2, %v1919_v25 }
   0xf   : > { %s1981_s16 = sshll.u32 %s2340_s12, 5  ;;  %351 = vst.msk [vmem:[#allocation3] sm:$0xff] %vm342_vm2, %v1917_v0  ;;  %352 = vst.msk [vmem:[#allocation3 + $0x8] sm:$0xff] %vm342_vm2, %v1917_v0 }
  0x10   : > { %s1987_s19 = scalar_lea.vmem %s2332_s1, %s1981_s16  ;;  %s1997_s22 = scalar_lea.vmem %s2331_s0, %s1981_s16  ;;  %353 = vst.msk [vmem:[#allocation3 + $0x10] sm:$0xff] %vm342_vm2, %v1917_v0  ;;  %354 = vst.msk [vmem:[#allocation3 + $0x18] sm:$0xff] %vm342_vm2, %v1917_v0 }
  0x11   : > { %v376_v1 = vld [vmem:[%s1987_s19] sm:$0xf]  ;;  %v377_v2 = vld [vmem:[%s1987_s19 + $0x4] sm:$0xf]  ;;  %v378_v5 = vld [vmem:[%s1987_s19 + $0x8] sm:$0xf]  ;;  %s2150_s25 = scalar_lea.vmem %s2333_s2, %s1981_s16  ;;  %s2304_s28 = scalar_lea.vmem %s2334_s3, %s1981_s16 }
  0x12   : > { %v397_v3 = vsel %vm359_vm0, %v376_v1, 0  ;;  %v443_v4 = vsel %vm359_vm0, %v377_v2, 0  ;;  %v379_v6 = vld [vmem:[%s1987_s19 + $0xc] sm:$0xf]  ;;  %v368_v7 = vld [vmem:[%s1997_s22] sm:$0xf] }
  0x13   : > { %1720 = vmatpush3.bf16.xpose.msra.mxu0 %v397_v3  ;;  %1726 = vmatpush3.bf16.xpose.msra.mxu1 %v443_v4  ;;  %v369_v8 = vld [vmem:[%s1997_s22 + $0x4] sm:$0xf]  ;;  %v489_v9 = vsel %vm359_vm0, %v378_v5, 0  ;;  %v535_v10 = vsel %vm359_vm0, %v379_v6, 0  ;;  %v380_v11 = vld [vmem:[%s1987_s19 + $0x10] sm:$0xf] }
  0x14   : > { %1731 = vmatprep.subr.bf16.mxu0 %v1917_v0  ;;  %1737 = vmatprep.subr.bf16.mxu1 %v1917_v0  ;;  %v381_v12 = vld [vmem:[%s1987_s19 + $0x14] sm:$0xf]  ;;  %v370_v13 = vld [vmem:[%s1997_s22 + $0x8] sm:$0xf]  ;;  %v371_v14 = vld [vmem:[%s1997_s22 + $0xc] sm:$0xf] }
  0x15   : > { %v581_v15 = vsel %vm359_vm0, %v380_v11, 0  ;;  %v627_v16 = vsel %vm359_vm0, %v381_v12, 0  ;;  %v382_v17 = vld [vmem:[%s1987_s19 + $0x18] sm:$0xf]  ;;  %v383_v18 = vld [vmem:[%s1987_s19 + $0x1c] sm:$0xf] }
  0x16   : > { %v372_v19 = vld [vmem:[%s1997_s22 + $0x10] sm:$0xf]  ;;  %v373_v20 = vld [vmem:[%s1997_s22 + $0x14] sm:$0xf]  ;;  %v673_v21 = vsel %vm359_vm0, %v382_v17, 0  ;;  %v719_v22 = vsel %vm359_vm0, %v383_v18, 0 }
  0x17   : > { %v374_v23 = vld [vmem:[%s1997_s22 + $0x18] sm:$0xf]  ;;  %v375_v24 = vld [vmem:[%s1997_s22 + $0x1c] sm:$0xf]  ;;  %355 = vst.msk [vmem:[#allocation3 + $0x20] sm:$0xff] %vm342_vm2, %v1917_v0  ;;  %356 = vst.msk [vmem:[#allocation3 + $0x28] sm:$0xff] %vm342_vm2, %v1917_v0 }
  0x18   : > { %357 = vst.msk [vmem:[#allocation3 + $0x30] sm:$0xff] %vm342_vm2, %v1917_v0  ;;  %358 = vst.msk [vmem:[#allocation3 + $0x38] sm:$0xff] %vm342_vm2, %v1917_v0  ;;  %v2107_v12 = vld [vmem:[#allocation2] sm:$0xff]  ;;  %v390_v62 = vld [vmem:[%s2150_s25 + $0x18] sm:$0xf] }
  0x1a   : > { %1722 = vmatmul.mubr.msk.bf16.vlgmr.msra.gmra.mrb[0].mxu0 %vm359_vm0, %v368_v7  ;;  %1728 = vmatmul.mubr.msk.bf16.vlgmr.msra.gmra.mrb[0].mxu1 %vm359_vm0, %v369_v8 }
  0x1b   : > { %1732 = vmatpush3.bf16.xpose.msra.mxu0 %v489_v9  ;;  %1738 = vmatpush3.bf16.xpose.msra.mxu1 %v535_v10 }
  0x1c   : > { %1733 = vmatprep.mubr.msk.bf16.mxu0 %vm1918_vm1, %v1917_v0  ;;  %1743 = vmatprep.subr.bf16.mxu0 %v1917_v0 }
  0x1d   : > { %1739 = vmatprep.mubr.msk.bf16.mxu1 %vm1918_vm1, %v1917_v0  ;;  %1749 = vmatprep.subr.bf16.mxu1 %v1917_v0 }
  0x22   : > { %1734 = vmatmul.mubr.msk.bf16.vlgmr.msra.gmra.mrb[4].mxu0 %vm359_vm0, %v370_v13  ;;  %1740 = vmatmul.mubr.msk.bf16.vlgmr.msra.gmra.mrb[4].mxu1 %vm359_vm0, %v371_v14 }
  0x23   : > { %1744 = vmatpush3.bf16.xpose.msra.mxu0 %v581_v15  ;;  %1750 = vmatpush3.bf16.xpose.msra.mxu1 %v627_v16  ;;  %v2112_v15 = vld [vmem:[#allocation2 + $0x8] sm:$0xff] }
  0x24   : > { %1745 = vmatprep.mubr.msk.bf16.mxu0 %vm1918_vm1, %v1917_v0  ;;  %1755 = vmatprep.subr.bf16.mxu0 %v1917_v0 }
  0x25   : > { %1751 = vmatprep.mubr.msk.bf16.mxu1 %vm1918_vm1, %v1917_v0  ;;  %1761 = vmatprep.subr.bf16.mxu1 %v1917_v0 }
  0x2a   : > { %1746 = vmatmul.mubr.msk.bf16.vlgmr.msra.gmra.mrb[8].mxu0 %vm359_vm0, %v372_v19  ;;  %1752 = vmatmul.mubr.msk.bf16.vlgmr.msra.gmra.mrb[8].mxu1 %vm359_vm0, %v373_v20  ;;  %v2122_v19 = vld [vmem:[#allocation2 + $0x10] sm:$0xff] }
  0x2b   : > { %1756 = vmatpush3.bf16.xpose.msra.mxu0 %v673_v21  ;;  %1762 = vmatpush3.bf16.xpose.msra.mxu1 %v719_v22 }
  0x2c   : > { %1757 = vmatprep.mubr.msk.bf16.mxu0 %vm1918_vm1, %v1917_v0  ;;  %1763 = vmatprep.mubr.msk.bf16.mxu1 %vm1918_vm1, %v1917_v0 }
  0x2d   : > { %1767 = vmatprep.subr.bf16.mxu0 %v1917_v0  ;;  %1773 = vmatprep.subr.bf16.mxu1 %v1917_v0 }
  0x32   : > { %1758 = vmatmul.mubr.msk.bf16.vlgmr.msra.gmra.mrb[12].mxu0 %vm359_vm0, %v374_v23  ;;  %1764 = vmatmul.mubr.msk.bf16.vlgmr.msra.gmra.mrb[12].mxu1 %vm359_vm0, %v375_v24  ;;  %v2132_v23 = vld [vmem:[#allocation2 + $0x18] sm:$0xff] }
  0x33   : > { %1769 = vmatprep.mubr.msk.bf16.mxu0 %vm1918_vm1, %v1917_v0  ;;  %1775 = vmatprep.mubr.msk.bf16.mxu1 %vm1918_vm1, %v1917_v0 }
  0xed   : > { %v433_v26 = vpop.f32.mrb[0].mxu0  ;;  %v479_v27 = vpop.f32.mrb[0].mxu1 }
  0xee   : > { %v2075_v28 = vmul.f32 0.5, %v433_v26  ;;  %v1723_v29 = vpop.f32.mrb[1].mxu0  ;;  %v2077_v30 = vmul.f32 0.5, %v479_v27  ;;  %v1729_v31 = vpop.f32.mrb[1].mxu1  ;;  %v2142_v27 = vld [vmem:[#allocation2 + $0x20] sm:$0xff] }
  0xef   : > { %v436_v32 = vpop.f32.mrb[2].mxu0  ;;  %v482_v33 = vpop.f32.mrb[2].mxu1  ;;  %v2144_v29 = vld [vmem:[#allocation2 + $0x28] sm:$0xff] }
  0xf0   : > { %v1724_v34 = vpop.f32.mrb[3].mxu0  ;;  %v778_v35 = vsel %vm777_vm3, %v2075_v28, -inf  ;;  %v1730_v36 = vpop.f32.mrb[3].mxu1  ;;  %v781_v37 = vsel %vm777_vm3, %v2077_v30, -inf  ;;  %v384_v32 = vld [vmem:[%s2150_s25] sm:$0xf] }
  0xf1   : > { %779 = vmax.xlane.f32.xlu0 %v778_v35  ;;  %v1024_v35 = vsel %vm1022_vm4, %v384_v32, 0 }
  0xf2   : > { %1768 = vmatpush3.bf16.msra.mxu0 %v1024_v35 }
  0xf3   : > { %1779 = vmatprep.subr.bf16.mxu0 %v1917_v0 }
  0xf5   : > { %782 = vmax.xlane.f32.xlu0 %v781_v37  ;;  %v525_v38 = vpop.f32.mrb[4].mxu0  ;;  %v571_v39 = vpop.f32.mrb[4].mxu1 }
  0xf6   : > { %v2083_v40 = vmul.f32 0.5, %v525_v38  ;;  %v1735_v41 = vpop.f32.mrb[5].mxu0  ;;  %v2085_v42 = vmul.f32 0.5, %v571_v39  ;;  %v1741_v43 = vpop.f32.mrb[5].mxu1 }
  0xf7   : > { %v528_v44 = vpop.f32.mrb[6].mxu0  ;;  %v574_v45 = vpop.f32.mrb[6].mxu1  ;;  %v385_v41 = vld [vmem:[%s2150_s25 + $0x4] sm:$0xf] }
  0xf8   : > { %v1736_v46 = vpop.f32.mrb[7].mxu0  ;;  %v784_v47 = vsel %vm777_vm3, %v2083_v40, -inf  ;;  %v1742_v48 = vpop.f32.mrb[7].mxu1  ;;  %v787_v49 = vsel %vm777_vm3, %v2085_v42, -inf  ;;  %v1070_v43 = vsel %vm1022_vm4, %v385_v41, 0  ;;  %v2177_v44 = vld [vmem:[#allocation2 + $0x30] sm:$0xff] }
  0xf9   : > { %785 = vmax.xlane.f32.xlu1 %v784_v47  ;;  %1774 = vmatpush3.bf16.msra.mxu1 %v1070_v43  ;;  %v2179_v45 = vld [vmem:[#allocation2 + $0x38] sm:$0xff]  ;;  %v386_v46 = vld [vmem:[%s2150_s25 + $0x8] sm:$0xf] }
  0xfa   : > { %1785 = vmatprep.subr.bf16.mxu1 %v1917_v0 }
  0xfd   : > { %788 = vmax.xlane.f32.xlu1 %v787_v49  ;;  %v617_v50 = vpop.f32.mrb[8].mxu0  ;;  %v663_v51 = vpop.f32.mrb[8].mxu1  ;;  %v1116_v49 = vsel %vm1022_vm4, %v386_v46, 0 }
  0xfe   : > { %v2091_v52 = vmul.f32 0.5, %v617_v50  ;;  %v1747_v53 = vpop.f32.mrb[9].mxu0  ;;  %v2093_v54 = vmul.f32 0.5, %v663_v51  ;;  %v1753_v55 = vpop.f32.mrb[9].mxu1 }
  0xff   : > { %v620_v56 = vpop.f32.mrb[10].mxu0  ;;  %v666_v57 = vpop.f32.mrb[10].mxu1 }
 0x100   : > { %v1748_v58 = vpop.f32.mrb[11].mxu0  ;;  %v790_v59 = vsel %vm777_vm3, %v2091_v52, -inf  ;;  %v1754_v60 = vpop.f32.mrb[11].mxu1  ;;  %v793_v61 = vsel %vm777_vm3, %v2093_v54, -inf  ;;  %v387_v56 = vld [vmem:[%s2150_s25 + $0xc] sm:$0xf] }
 0x101   : > { %791 = vmax.xlane.f32.xlu0 %v790_v59  ;;  %794 = vmax.xlane.f32.xlu1 %v793_v61  ;;  %v1162_v57 = vsel %vm1022_vm4, %v387_v56, 0  ;;  %v388_v58 = vld [vmem:[%s2150_s25 + $0x10] sm:$0xf]  ;;  %v389_v60 = vld [vmem:[%s2150_s25 + $0x14] sm:$0xf] }
 0x102   : > { %v1208_v59 = vsel %vm1022_vm4, %v388_v58, 0  ;;  %v2207_v61 = vsel %vm1022_vm4, %v389_v60, 0 }
 0x105   : > { %v709_v63 = vpop.f32.mrb[12].mxu0  ;;  %v755_v1 = vpop.f32.mrb[12].mxu1 }
 0x106   : > { %v2099_v2 = vmul.f32 0.5, %v709_v63  ;;  %v1759_v3 = vpop.f32.mrb[13].mxu0  ;;  %v2101_v4 = vmul.f32 0.5, %v755_v1  ;;  %v1765_v5 = vpop.f32.mrb[13].mxu1  ;;  %v2211_v63 = vsel %vm1022_vm4, %v390_v62, 0 }
 0x107   : > { %v712_v6 = vpop.f32.mrb[14].mxu0  ;;  %v758_v7 = vpop.f32.mrb[14].mxu1  ;;  %v391_v1 = vld [vmem:[%s2150_s25 + $0x1c] sm:$0xf] }
 0x108   : > { %v1760_v8 = vpop.f32.mrb[15].mxu0  ;;  %v796_v9 = vsel %vm777_vm3, %v2099_v2, -inf  ;;  %v1766_v10 = vpop.f32.mrb[15].mxu1  ;;  %v799_v11 = vsel %vm777_vm3, %v2101_v4, -inf  ;;  %v2215_v3 = vsel %vm1022_vm4, %v391_v1, 0 }
 0x109   : > { %797 = vmax.xlane.f32.xlu0 %v796_v9  ;;  %800 = vmax.xlane.f32.xlu1 %v799_v11 }
 0x17e   : > { %v780_v13 = vpop.xlane.xlu0 %779 }
 0x17f   : > { %v2110_v14 = vmax.f32 %v2107_v12, %v780_v13 }
 0x181   : > { %v810_v16 = vsub.f32 %v2107_v12, %v2110_v14  ;;  %1404 = vst.msk [vmem:[#allocation2] sm:$0xff] %vm342_vm2, %v2110_v14  ;;  %836 = vperm.xlu0 %1843, %v2110_v14  }
 0x182   : > { %v783_v17 = vpop.xlane.xlu0 %782 }
 0x183   : > { %v2120_v18 = vmax.f32 %v2112_v15, %v783_v17 }
 0x185   : > { %v811_v20 = vsub.f32 %v2112_v15, %v2120_v18  ;;  %1405 = vst.msk [vmem:[#allocation2 + $0x8] sm:$0xff] %vm342_vm2, %v2120_v18  ;;  %841 = vperm.xlu1 %1844, %v2120_v18  }
 0x186   : > { %v786_v21 = vpop.xlane.xlu1 %785 }
 0x187   : > { %v2130_v22 = vmax.f32 %v2122_v19, %v786_v21 }
 0x189   : > { %v812_v24 = vsub.f32 %v2122_v19, %v2130_v22  ;;  %1406 = vst.msk [vmem:[#allocation2 + $0x10] sm:$0xff] %vm342_vm2, %v2130_v22  ;;  %846 = vperm.xlu1 %1844, %v2130_v22  }
 0x18a   : > { %v789_v25 = vpop.xlane.xlu1 %788 }
 0x18b   : > { %v2140_v26 = vmax.f32 %v2132_v23, %v789_v25 }
 0x18d   : > { %v813_v31 = vsub.f32 %v2132_v23, %v2140_v26  ;;  %1407 = vst.msk [vmem:[#allocation2 + $0x18] sm:$0xff] %vm342_vm2, %v2140_v26  ;;  %851 = vperm.xlu1 %1844, %v2140_v26  }
 0x18e   : > { %v792_v33 = vpop.xlane.xlu0 %791  ;;  %v795_v34 = vpop.xlane.xlu1 %794 }
 0x18f   : > { %v2160_v36 = vmax.f32 %v2142_v27, %v792_v33  ;;  %v2163_v37 = vmax.f32 %v2144_v29, %v795_v34 }
 0x191   : > { %v814_v38 = vsub.f32 %v2142_v27, %v2160_v36  ;;  %1408 = vst.msk [vmem:[#allocation2 + $0x20] sm:$0xff] %vm342_vm2, %v2160_v36  ;;  %856 = vperm.xlu1 %1844, %v2160_v36   ;;  %v815_v39 = vsub.f32 %v2144_v29, %v2163_v37  ;;  %1409 = vst.msk [vmem:[#allocation2 + $0x28] sm:$0xff] %vm342_vm2, %v2163_v37  ;;  %v898_v29 = vld [vmem:[#allocation3] sm:$0xff] }
 0x193   : > { %v826_v15 = vmul.f32 1.442695, %v814_v38  ;;  %v828_v12 = vmul.f32 1.442695, %v815_v39 }
 0x195   : > { %861 = vperm.xlu1 %1844, %v2163_v37   ;;  %v899_v37 = vld [vmem:[#allocation3 + $0x8] sm:$0xff] }
 0x196   : > { %v798_v47 = vpop.xlane.xlu0 %797  ;;  %v801_v48 = vpop.xlane.xlu1 %800 }
 0x197   : > { %v2186_v50 = vmax.f32 %v2177_v44, %v798_v47  ;;  %v2189_v51 = vmax.f32 %v2179_v45, %v801_v48 }
 0x199   : > { %v816_v53 = vsub.f32 %v2177_v44, %v2186_v50  ;;  %1410 = vst.msk [vmem:[#allocation2 + $0x30] sm:$0xff] %vm342_vm2, %v2186_v50  ;;  %866 = vperm.xlu1 %1844, %v2186_v50   ;;  %v817_v55 = vsub.f32 %v2179_v45, %v2189_v51  ;;  %1411 = vst.msk [vmem:[#allocation2 + $0x38] sm:$0xff] %vm342_vm2, %v2189_v51  ;;  %v900_v45 = vld [vmem:[#allocation3 + $0x10] sm:$0xff] }
 0x19b   : > { %v830_v14 = vmul.f32 1.442695, %v816_v53 }
 0x19d   : > { %871 = vperm.xlu1 %1844, %v2189_v51  }
 0x200   : > { %v837_v5 = vpop.permute.xlu0 %836 }
 0x201   : > { %v874_v6 = vsub.f32 %v2075_v28, %v837_v5 }
 0x203   : > { %v882_v7 = vmul.f32 1.442695, %v874_v6 }
 0x204   : > { %v842_v8 = vpop.permute.xlu1 %841 }
 0x205   : > { %1845 = vpow2.f32 %v882_v7  ;;  %v875_v9 = vsub.f32 %v2077_v30, %v842_v8 }
 0x207   : > { %v884_v10 = vmul.f32 1.442695, %v875_v9 }
 0x208   : > { %v847_v11 = vpop.permute.xlu1 %846 }
 0x209   : > { %1847 = vpow2.f32 %v884_v10  ;;  %v876_v13 = vsub.f32 %v2083_v40, %v847_v11 }
 0x20b   : > { %v886_v17 = vmul.f32 1.442695, %v876_v13 }
 0x20c   : > { %v852_v21 = vpop.permute.xlu1 %851 }
 0x20d   : > { %1849 = vpow2.f32 %v886_v17  ;;  %v877_v25 = vsub.f32 %v2085_v42, %v852_v21 }
 0x20f   : > { %v1846_v32 = vpop.eup %1845  ;;  %v888_v33 = vmul.f32 1.442695, %v877_v25  ;;  %v822_v25 = vmul.f32 1.442695, %v812_v24 }
 0x210   : > { %v857_v34 = vpop.permute.xlu1 %856  ;;  %v914_v28 = vsel %vm777_vm3, %v1846_v32, 0.0  ;;  %v1011_v35 = vpack.c.bf16 %v1846_v32, %v1846_v32  ;;  %v824_v32 = vmul.f32 1.442695, %v813_v31 }
 0x211   : > { %1851 = vpow2.f32 %v888_v33  ;;  %v878_v41 = vsub.f32 %v2091_v52, %v857_v34  ;;  %915 = vadd.xlane.f32.xlu1 %v914_v28 }
 0x212   : > { %1770 = vmatmul.mubr.msk.bf16.vlgmr.msra.gmra.mrb[16].mxu0 %vm777_vm3, %v1011_v35 }
 0x213   : > { %v1848_v30 = vpop.eup %1847  ;;  %v890_v43 = vmul.f32 1.442695, %v878_v41  ;;  %1780 = vmatpush3.bf16.msra.mxu0 %v1116_v49  ;;  %1781 = vmatprep.mubr.msk.bf16.mxu0 %vm1918_vm1, %v1917_v0  ;;  %v902_v41 = vld [vmem:[#allocation3 + $0x20] sm:$0xff] }
 0x214   : > { %v862_v40 = vpop.permute.xlu1 %861  ;;  %v917_v42 = vsel %vm777_vm3, %v1848_v30, 0.0  ;;  %v1012_v46 = vpack.c.bf16 %v1848_v30, %v1848_v30  ;;  %1791 = vmatprep.subr.bf16.mxu0 %v1917_v0 }
 0x215   : > { %1853 = vpow2.f32 %v890_v43  ;;  %v879_v47 = vsub.f32 %v2093_v54, %v862_v40  ;;  %918 = vadd.xlane.f32.xlu0 %v917_v42 }
 0x216   : > { %1776 = vmatmul.mubr.msk.bf16.vlgmr.msra.gmra.mrb[16].mxu1 %vm777_vm3, %v1012_v46  ;;  %v903_v46 = vld [vmem:[#allocation3 + $0x28] sm:$0xff] }
 0x217   : > { %v1850_v52 = vpop.eup %1849  ;;  %v892_v48 = vmul.f32 1.442695, %v879_v47  ;;  %1786 = vmatpush3.bf16.msra.mxu1 %v1162_v57  ;;  %1787 = vmatprep.mubr.msk.bf16.mxu1 %vm1918_vm1, %v1917_v0 }
 0x218   : > { %v867_v49 = vpop.permute.xlu1 %866  ;;  %v920_v56 = vsel %vm777_vm3, %v1850_v52, 0.0  ;;  %v1013_v58 = vpack.c.bf16 %v1850_v52, %v1850_v52  ;;  %1797 = vmatprep.subr.bf16.mxu1 %v1917_v0 }
 0x219   : > { %1855 = vpow2.f32 %v892_v48  ;;  %v880_v60 = vsub.f32 %v2099_v2, %v867_v49  ;;  %921 = vadd.xlane.f32.xlu0 %v920_v56  ;;  %v904_v56 = vld [vmem:[#allocation3 + $0x30] sm:$0xff] }
 0x21a   : > { %1782 = vmatmul.mubr.msk.bf16.vlgmr.msra.gmra.mrb[20].mxu0 %vm777_vm3, %v1013_v58 }
 0x21b   : > { %v1852_v54 = vpop.eup %1851  ;;  %v894_v62 = vmul.f32 1.442695, %v880_v60  ;;  %1792 = vmatpush3.bf16.msra.mxu0 %v1208_v59  ;;  %1793 = vmatprep.mubr.msk.bf16.mxu0 %vm1918_vm1, %v1917_v0 }
 0x21c   : > { %v872_v57 = vpop.permute.xlu1 %871  ;;  %v923_v1 = vsel %vm777_vm3, %v1852_v54, 0.0  ;;  %v1014_v5 = vpack.c.bf16 %v1852_v54, %v1852_v54  ;;  %1803 = vmatprep.subr.bf16.mxu0 %v1917_v0 }
 0x21d   : > { %1857 = vpow2.f32 %v894_v62  ;;  %v881_v6 = vsub.f32 %v2101_v4, %v872_v57  ;;  %924 = vadd.xlane.f32.xlu1 %v923_v1  ;;  %v905_v1 = vld [vmem:[#allocation3 + $0x38] sm:$0xff] }
 0x21e   : > { %1788 = vmatmul.mubr.msk.bf16.vlgmr.msra.gmra.mrb[20].mxu1 %vm777_vm3, %v1014_v5 }
 0x21f   : > { %v1854_v2 = vpop.eup %1853  ;;  %v896_v7 = vmul.f32 1.442695, %v881_v6  ;;  %1798 = vmatpush3.bf16.msra.mxu1 %v2207_v61  ;;  %1799 = vmatprep.mubr.msk.bf16.mxu1 %vm1918_vm1, %v1917_v0 }
 0x220   : > { %v926_v59 = vsel %vm777_vm3, %v1854_v2, 0.0  ;;  %v1015_v8 = vpack.c.bf16 %v1854_v2, %v1854_v2  ;;  %1809 = vmatprep.subr.bf16.mxu1 %v1917_v0 }
 0x221   : > { %1859 = vpow2.f32 %v896_v7  ;;  %927 = vadd.xlane.f32.xlu0 %v926_v59 }
 0x222   : > { %1794 = vmatmul.mubr.msk.bf16.vlgmr.msra.gmra.mrb[24].mxu0 %vm777_vm3, %v1015_v8 }
 0x223   : > { %v1856_v4 = vpop.eup %1855  ;;  %1804 = vmatpush3.bf16.msra.mxu0 %v2211_v63  ;;  %1805 = vmatprep.mubr.msk.bf16.mxu0 %vm1918_vm1, %v1917_v0 }
 0x224   : > { %v929_v61 = vsel %vm777_vm3, %v1856_v4, 0.0  ;;  %v1016_v9 = vpack.c.bf16 %v1856_v4, %v1856_v4 }
 0x225   : > { %930 = vadd.xlane.f32.xlu1 %v929_v61 }
 0x226   : > { %1800 = vmatmul.mubr.msk.bf16.vlgmr.msra.gmra.mrb[24].mxu1 %vm777_vm3, %v1016_v9 }
 0x227   : > { %v1858_v10 = vpop.eup %1857  ;;  %1810 = vmatpush3.bf16.msra.mxu1 %v2215_v3  ;;  %1811 = vmatprep.mubr.msk.bf16.mxu1 %vm1918_vm1, %v1917_v0  ;;  %v820_v3 = vmul.f32 1.442695, %v811_v20  ;;  %v818_v0 = vmul.f32 1.442695, %v810_v16  ;;  %v832_v16 = vmul.f32 1.442695, %v817_v55 }
 0x228   : > { %v932_v11 = vsel %vm777_vm3, %v1858_v10, 0.0  ;;  %v1017_v13 = vpack.c.bf16 %v1858_v10, %v1858_v10  ;;  %v901_v55 = vld [vmem:[#allocation3 + $0x18] sm:$0xff] }
 0x229   : > { %933 = vadd.xlane.f32.xlu0 %v932_v11  ;;  %1861 = vpow2.f32 %v820_v3  ;;  %v955_v3 = vld [vmem:[#allocation4] sm:$0xff] }
 0x22a   : > { %1806 = vmatmul.mubr.msk.bf16.vlgmr.msra.gmra.mrb[28].mxu0 %vm777_vm3, %v1017_v13  ;;  %1863 = vpow2.f32 %v818_v0 }
 0x22b   : > { %v1860_v63 = vpop.eup %1859  ;;  %1865 = vpow2.f32 %v822_v25 }
 0x22c   : > { %v935_v17 = vsel %vm777_vm3, %v1860_v63, 0.0  ;;  %v1018_v21 = vpack.c.bf16 %v1860_v63, %v1860_v63  ;;  %1867 = vpow2.f32 %v824_v32 }
 0x22d   : > { %936 = vadd.xlane.f32.xlu1 %v935_v17  ;;  %1869 = vpow2.f32 %v826_v15  ;;  %v956_v15 = vld [vmem:[#allocation4 + $0x8] sm:$0xff] }
 0x22e   : > { %1812 = vmatmul.mubr.msk.bf16.vlgmr.msra.gmra.mrb[28].mxu1 %vm777_vm3, %v1018_v21  ;;  %1871 = vpow2.f32 %v828_v12 }
 0x22f   : > { %1873 = vpow2.f32 %v830_v14 }
 0x230   : > { %1875 = vpow2.f32 %v832_v16 }
 0x233   : > { %v1862_v18 = vpop.eup %1861 }
 0x234   : > { %v1864_v19 = vpop.eup %1863  ;;  %v907_v39 = vmul.f32 %v1862_v18, %v899_v37  ;;  %v958_v37 = vld [vmem:[#allocation4 + $0x18] sm:$0xff] }
 0x235   : > { %v1866_v20 = vpop.eup %1865  ;;  %v906_v31 = vmul.f32 %v1864_v19, %v898_v29 }
 0x236   : > { %v1868_v22 = vpop.eup %1867  ;;  %v908_v51 = vmul.f32 %v1866_v20, %v900_v45 }
 0x237   : > { %v1870_v23 = vpop.eup %1869  ;;  %v909_v28 = vmul.f32 %v1868_v22, %v901_v55  ;;  %v959_v55 = vld [vmem:[#allocation4 + $0x20] sm:$0xff] }
 0x238   : > { %v1872_v24 = vpop.eup %1871  ;;  %v910_v40 = vmul.f32 %v1870_v23, %v902_v41 }
 0x239   : > { %v1874_v26 = vpop.eup %1873  ;;  %v911_v48 = vmul.f32 %v1872_v24, %v903_v46 }
 0x23a   : > { %v1876_v27 = vpop.eup %1875  ;;  %v912_v62 = vmul.f32 %v1874_v26, %v904_v56 }
 0x23b   : > { %v913_v7 = vmul.f32 %v1876_v27, %v905_v1 }
 0x23e   : > { %970 = vperm.xlu1 %1844, %v1862_v18  }
 0x23f   : > { %965 = vperm.xlu0 %1843, %v1864_v19  }
 0x242   : > { %975 = vperm.xlu1 %1844, %v1866_v20  }
 0x243   : > { %980 = vperm.xlu0 %1843, %v1868_v22   ;;  %v957_v22 = vld [vmem:[#allocation4 + $0x10] sm:$0xff] }
 0x246   : > { %985 = vperm.xlu1 %1844, %v1870_v23  }
 0x247   : > { %990 = vperm.xlu0 %1843, %v1872_v24  }
 0x24a   : > { %995 = vperm.xlu1 %1844, %v1874_v26  }
 0x24b   : > { %1000 = vperm.xlu0 %1843, %v1876_v27  }
 0x29e   : > { %v916_v36 = vpop.xlane.xlu1 %915 }
 0x29f   : > { %v938_v38 = vadd.f32 %v916_v36, %v906_v31 }
 0x2a1   : > { %947 = vst.msk [vmem:[#allocation3] sm:$0xff] %vm342_vm2, %v938_v38 }
 0x2a2   : > { %v919_v44 = vpop.xlane.xlu0 %918 }
 0x2a3   : > { %v939_v50 = vadd.f32 %v919_v44, %v907_v39 }
 0x2a5   : > { %948 = vst.msk [vmem:[#allocation3 + $0x8] sm:$0xff] %vm342_vm2, %v939_v50 }
 0x2a6   : > { %v922_v53 = vpop.xlane.xlu0 %921 }
 0x2a7   : > { %v940_v33 = vadd.f32 %v922_v53, %v908_v51 }
 0x2a8   : > { %v1415_v34 = vld [vmem:[#allocation3] sm:$0xff] }
 0x2a9   : > { %949 = vst.msk [vmem:[#allocation3 + $0x10] sm:$0xff] %vm342_vm2, %v940_v33  ;;  %1877 = vrcp.f32 %v1415_v34 }
 0x2aa   : > { %v925_v35 = vpop.xlane.xlu1 %924 }
 0x2ab   : > { %v941_v30 = vadd.f32 %v925_v35, %v909_v28 }
 0x2ac   : > { %v1416_v43 = vld [vmem:[#allocation3 + $0x8] sm:$0xff] }
 0x2ad   : > { %950 = vst.msk [vmem:[#allocation3 + $0x18] sm:$0xff] %vm342_vm2, %v941_v30  ;;  %1879 = vrcp.f32 %v1416_v43 }
 0x2ae   : > { %v928_v42 = vpop.xlane.xlu0 %927 }
 0x2af   : > { %v942_v47 = vadd.f32 %v928_v42, %v910_v40  ;;  %v960_v40 = vld [vmem:[#allocation4 + $0x28] sm:$0xff] }
 0x2b0   : > { %v1417_v52 = vld [vmem:[#allocation3 + $0x10] sm:$0xff] }
 0x2b1   : > { %951 = vst.msk [vmem:[#allocation3 + $0x20] sm:$0xff] %vm342_vm2, %v942_v47  ;;  %1881 = vrcp.f32 %v1417_v52 }
 0x2b2   : > { %v931_v49 = vpop.xlane.xlu1 %930 }
 0x2b3   : > { %v1878_v58 = vpop.eup %1877  ;;  %v943_v60 = vadd.f32 %v931_v49, %v911_v48 }
 0x2b4   : > { %1441 = vperm.xlu1 %1844, %v1878_v58   ;;  %v1418_v54 = vld [vmem:[#allocation3 + $0x18] sm:$0xff]  ;;  %v961_v58 = vld [vmem:[#allocation4 + $0x30] sm:$0xff] }
 0x2b5   : > { %952 = vst.msk [vmem:[#allocation3 + $0x28] sm:$0xff] %vm342_vm2, %v943_v60  ;;  %1883 = vrcp.f32 %v1418_v54 }
 0x2b6   : > { %v934_v57 = vpop.xlane.xlu0 %933 }
 0x2b7   : > { %v1880_v5 = vpop.eup %1879  ;;  %v944_v6 = vadd.f32 %v934_v57, %v912_v62 }
 0x2b8   : > { %1446 = vperm.xlu0 %1843, %v1880_v5   ;;  %v1419_v2 = vld [vmem:[#allocation3 + $0x20] sm:$0xff] }
 0x2b9   : > { %953 = vst.msk [vmem:[#allocation3 + $0x30] sm:$0xff] %vm342_vm2, %v944_v6  ;;  %1885 = vrcp.f32 %v1419_v2  ;;  %v962_v2 = vld [vmem:[#allocation4 + $0x38] sm:$0xff] }
 0x2ba   : > { %v937_v59 = vpop.xlane.xlu1 %936 }
 0x2bb   : > { %v1882_v8 = vpop.eup %1881  ;;  %v945_v4 = vadd.f32 %v937_v59, %v913_v7 }
 0x2bc   : > { %1451 = vperm.xlu1 %1844, %v1882_v8   ;;  %v1420_v61 = vld [vmem:[#allocation3 + $0x28] sm:$0xff] }
 0x2bd   : > { %954 = vst.msk [vmem:[#allocation3 + $0x38] sm:$0xff] %vm342_vm2, %v945_v4  ;;  %1887 = vrcp.f32 %v1420_v61 }
 0x2be   : > { %v966_v0 = vpop.permute.xlu0 %965  ;;  %v971_v25 = vpop.permute.xlu1 %970 }
 0x2bf   : > { %v1884_v9 = vpop.eup %1883  ;;  %v1003_v32 = vmul.f32 %v966_v0, %v955_v3  ;;  %v1004_v19 = vmul.f32 %v971_v25, %v956_v15 }
 0x2c0   : > { %1456 = vperm.xlu0 %1843, %v1884_v9   ;;  %v1421_v10 = vld [vmem:[#allocation3 + $0x30] sm:$0xff] }
 0x2c1   : > { %1889 = vrcp.f32 %v1421_v10 }
 0x2c2   : > { %v976_v23 = vpop.permute.xlu1 %975  ;;  %v981_v38 = vpop.permute.xlu0 %980 }
 0x2c3   : > { %v1886_v11 = vpop.eup %1885  ;;  %v1005_v31 = vmul.f32 %v976_v23, %v957_v22  ;;  %v1006_v51 = vmul.f32 %v981_v38, %v958_v37 }
 0x2c4   : > { %1461 = vperm.xlu1 %1844, %v1886_v11   ;;  %v1422_v13 = vld [vmem:[#allocation3 + $0x38] sm:$0xff] }
 0x2c5   : > { %1891 = vrcp.f32 %v1422_v13 }
 0x2c6   : > { %v986_v33 = vpop.permute.xlu1 %985  ;;  %v991_v42 = vpop.permute.xlu0 %990 }
 0x2c7   : > { %v1888_v63 = vpop.eup %1887  ;;  %v1007_v30 = vmul.f32 %v986_v33, %v959_v55  ;;  %v1008_v49 = vmul.f32 %v991_v42, %v960_v40 }
 0x2c8   : > { %1466 = vperm.xlu0 %1843, %v1888_v63  }
 0x2ca   : > { %v996_v60 = vpop.permute.xlu1 %995  ;;  %v1001_v7 = vpop.permute.xlu0 %1000 }
 0x2cb   : > { %v1890_v17 = vpop.eup %1889  ;;  %v1009_v5 = vmul.f32 %v996_v60, %v961_v58  ;;  %v1010_v9 = vmul.f32 %v1001_v7, %v962_v2 }
 0x2cc   : > { %1471 = vperm.xlu1 %1844, %v1890_v17  }
 0x2cf   : > { %v1892_v21 = vpop.eup %1891 }
 0x2d0   : > { %1476 = vperm.xlu0 %1843, %v1892_v21  }
 0x2e5   : > { %v1060_v12 = vpop.f32.mrb[16].mxu0 }
 0x2e6   : > { %v1388_v14 = vadd.f32 %v1060_v12, %v1003_v32  ;;  %v1771_v16 = vpop.f32.mrb[17].mxu0 }
 0x2e7   : > { %v1063_v18 = vpop.f32.mrb[18].mxu0 }
 0x2e8   : > { %1396 = vst.msk [vmem:[#allocation4] sm:$0xff] %vm359_vm0, %v1388_v14  ;;  %v1772_v20 = vpop.f32.mrb[19].mxu0 }
 0x2e9   : > { %v1106_v24 = vpop.f32.mrb[16].mxu1 }
 0x2ea   : > { %v1389_v26 = vadd.f32 %v1106_v24, %v1004_v19  ;;  %v1777_v27 = vpop.f32.mrb[17].mxu1 }
 0x2eb   : > { %v1109_v29 = vpop.f32.mrb[18].mxu1 }
 0x2ec   : > { %1397 = vst.msk [vmem:[#allocation4 + $0x8] sm:$0xff] %vm359_vm0, %v1389_v26  ;;  %v1778_v36 = vpop.f32.mrb[19].mxu1 }
 0x2ed   : > { %v1152_v39 = vpop.f32.mrb[20].mxu0 }
 0x2ee   : > { %v1390_v44 = vadd.f32 %v1152_v39, %v1005_v31  ;;  %v1783_v45 = vpop.f32.mrb[21].mxu0 }
 0x2ef   : > { %v1155_v50 = vpop.f32.mrb[22].mxu0  ;;  %v1431_v0 = vld [vmem:[#allocation4] sm:$0xff] }
 0x2f0   : > { %1398 = vst.msk [vmem:[#allocation4 + $0x10] sm:$0xff] %vm359_vm0, %v1390_v44  ;;  %v1784_v53 = vpop.f32.mrb[23].mxu0 }
 0x2f1   : > { %v1198_v34 = vpop.f32.mrb[20].mxu1 }
 0x2f2   : > { %v1391_v28 = vadd.f32 %v1198_v34, %v1006_v51  ;;  %v1789_v35 = vpop.f32.mrb[21].mxu1 }
 0x2f3   : > { %v1201_v41 = vpop.f32.mrb[22].mxu1  ;;  %v1432_v15 = vld [vmem:[#allocation4 + $0x8] sm:$0xff] }
 0x2f4   : > { %1399 = vst.msk [vmem:[#allocation4 + $0x18] sm:$0xff] %vm359_vm0, %v1391_v28  ;;  %v1790_v43 = vpop.f32.mrb[23].mxu1 }
 0x2f5   : > { %v1244_v46 = vpop.f32.mrb[24].mxu0 }
 0x2f6   : > { %v1392_v47 = vadd.f32 %v1244_v46, %v1007_v30  ;;  %v1795_v52 = vpop.f32.mrb[25].mxu0 }
 0x2f7   : > { %v1247_v48 = vpop.f32.mrb[26].mxu0  ;;  %v1433_v19 = vld [vmem:[#allocation4 + $0x10] sm:$0xff] }
 0x2f8   : > { %1400 = vst.msk [vmem:[#allocation4 + $0x20] sm:$0xff] %vm359_vm0, %v1392_v47  ;;  %v1796_v56 = vpop.f32.mrb[27].mxu0 }
 0x2f9   : > { %v1290_v54 = vpop.f32.mrb[24].mxu1 }
 0x2fa   : > { %v1393_v62 = vadd.f32 %v1290_v54, %v1008_v49  ;;  %v1801_v57 = vpop.f32.mrb[25].mxu1 }
 0x2fb   : > { %v1293_v1 = vpop.f32.mrb[26].mxu1  ;;  %v1434_v23 = vld [vmem:[#allocation4 + $0x18] sm:$0xff] }
 0x2fc   : > { %1401 = vst.msk [vmem:[#allocation4 + $0x28] sm:$0xff] %vm359_vm0, %v1393_v62  ;;  %v1802_v6 = vpop.f32.mrb[27].mxu1 }
 0x2fd   : > { %v1336_v59 = vpop.f32.mrb[28].mxu0 }
 0x2fe   : > { %v1394_v8 = vadd.f32 %v1336_v59, %v1009_v5  ;;  %v1807_v4 = vpop.f32.mrb[29].mxu0 }
 0x2ff   : > { %v1339_v61 = vpop.f32.mrb[30].mxu0  ;;  %v1435_v31 = vld [vmem:[#allocation4 + $0x20] sm:$0xff] }
 0x300   : > { %1402 = vst.msk [vmem:[#allocation4 + $0x30] sm:$0xff] %vm359_vm0, %v1394_v8  ;;  %v1808_v10 = vpop.f32.mrb[31].mxu0 }
 0x301   : > { %v1382_v11 = vpop.f32.mrb[28].mxu1 }
 0x302   : > { %v1395_v13 = vadd.f32 %v1382_v11, %v1010_v9  ;;  %v1813_v63 = vpop.f32.mrb[29].mxu1 }
 0x303   : > { %v1385_v17 = vpop.f32.mrb[30].mxu1  ;;  %v1436_v38 = vld [vmem:[#allocation4 + $0x28] sm:$0xff] }
 0x304   : > { %1403 = vst.msk [vmem:[#allocation4 + $0x38] sm:$0xff] %vm359_vm0, %v1395_v13  ;;  %v1814_v21 = vpop.f32.mrb[31].mxu1 }
 0x307   : > { %v1437_v51 = vld [vmem:[#allocation4 + $0x30] sm:$0xff] }
 0x30b   : > { %v1438_v33 = vld [vmem:[#allocation4 + $0x38] sm:$0xff] }
 0x333   : > { %v1442_v3 = vpop.permute.xlu1 %1441 }
 0x334   : > { %v1479_v25 = vmul.f32 %v1442_v3, %v1431_v0 }
 0x336   : > { %v1487_v32 = vpack.c.bf16 %v1479_v25, %v1479_v25 }
 0x337   : > { %v1447_v12 = vpop.permute.xlu0 %1446 }
 0x338   : > { %1496 = vst.msk [vmem:[%s2304_s28] sm:$0xf] %vm1495_vm5, %v1487_v32  ;;  %v1480_v14 = vmul.f32 %v1447_v12, %v1432_v15 }
 0x33a   : > { %v1488_v16 = vpack.c.bf16 %v1480_v14, %v1480_v14 }
 0x33b   : > { %v1452_v18 = vpop.permute.xlu1 %1451 }
 0x33c   : > { %1497 = vst.msk [vmem:[%s2304_s28 + $0x4] sm:$0xf] %vm1495_vm5, %v1488_v16  ;;  %v1481_v20 = vmul.f32 %v1452_v18, %v1433_v19 }
 0x33e   : > { %v1489_v22 = vpack.c.bf16 %v1481_v20, %v1481_v20 }
 0x33f   : > { %v1457_v24 = vpop.permute.xlu0 %1456 }
 0x340   : > { %1498 = vst.msk [vmem:[%s2304_s28 + $0x8] sm:$0xf] %vm1495_vm5, %v1489_v22  ;;  %v1482_v26 = vmul.f32 %v1457_v24, %v1434_v23 }
 0x342   : > { %v1490_v27 = vpack.c.bf16 %v1482_v26, %v1482_v26 }
 0x343   : > { %v1462_v29 = vpop.permute.xlu1 %1461 }
 0x344   : > { %1499 = vst.msk [vmem:[%s2304_s28 + $0xc] sm:$0xf] %vm1495_vm5, %v1490_v27  ;;  %v1483_v36 = vmul.f32 %v1462_v29, %v1435_v31 }
 0x346   : > { %v1491_v37 = vpack.c.bf16 %v1483_v36, %v1483_v36 }
 0x347   : > { %v1467_v39 = vpop.permute.xlu0 %1466 }
 0x348   : > { %1500 = vst.msk [vmem:[%s2304_s28 + $0x10] sm:$0xf] %vm1495_vm5, %v1491_v37  ;;  %v1484_v44 = vmul.f32 %v1467_v39, %v1436_v38 }
 0x34a   : > { %v1492_v45 = vpack.c.bf16 %v1484_v44, %v1484_v44 }
 0x34b   : > { %v1472_v50 = vpop.permute.xlu1 %1471 }
 0x34c   : > { %1501 = vst.msk [vmem:[%s2304_s28 + $0x14] sm:$0xf] %vm1495_vm5, %v1492_v45  ;;  %v1485_v53 = vmul.f32 %v1472_v50, %v1437_v51 }
 0x34e   : > { %v1493_v55 = vpack.c.bf16 %v1485_v53, %v1485_v53 }
 0x34f   : > { %v1477_v34 = vpop.permute.xlu0 %1476 }
 0x350   : > { %1502 = vst.msk [vmem:[%s2304_s28 + $0x18] sm:$0xf] %vm1495_vm5, %v1493_v55  ;;  %v1486_v28 = vmul.f32 %v1477_v34, %v1438_v33 }
 0x352   : > { %v1494_v35 = vpack.c.bf16 %v1486_v28, %v1486_v28 }
 0x354   : > { %1503 = vst.msk [vmem:[%s2304_s28 + $0x1c] sm:$0xf] %vm1495_vm5, %v1494_v35 }
 0x355 PF: > { %s13_s14 = sadd.s32 1, %s1915_s14   ;;  %s2335_s12 = smov %s1911_s13 }
 0x356   : > { %p10_p5 = scmp.ge.s32.totalorder %s13_s14, 4   ;;  %s2336_s13 = smov %s2338_s15 }
 0x358   :  { %12 = sbr.rel (!%p10_p5) target bundleno = 2 (0x2), region = 76 }

</bundles_post_ra>
